<compile_context>
chip_gen: v6e
topology: v6e:2x2x1
jax: 0.10.0
libtpu: 0.0.40
codegen_flags: <defaults>
</compile_context>

<pallas_src>
import functools
import math

import jax
import jax.numpy as jnp
from jax.experimental import pallas as pl
from jax.experimental.pallas import tpu as pltpu


def _round_up(x, m):
    return ((x + m - 1) // m) * m


def _is_older_tpu():
    """True on v3/v4/v5 parts (128-wide MXU, single vstore slot) -> smaller kv chunk."""
    try:
        kind = jax.devices()[0].device_kind.lower()
        return ("v3" in kind) or ("v4" in kind) or ("v5" in kind)
    except Exception:
        return False


def _vmem_limit_bytes():
    """Generation-aware VMEM limit (leave headroom below physical capacity)."""
    try:
        cap = int(pltpu.get_tpu_info().vmem_capacity_bytes)
    except Exception:
        cap = 128 * 1024 * 1024
    return int(min(max(cap * 3 // 4, 32 * 1024 * 1024), 96 * 1024 * 1024))


# --------------------------------------------------------------------------- fused kernel
def _cross_atten_kernel(q_raw_ref, kv_raw_ref, w_ref, b_ref, wo_ref, bo_ref, mask_ref,
                        o_ref, kvp_ref, *, tk, n_k, use_mask):
    """Fused projections + flash attention + output projection for one (batch, q-tile).

    q_raw_ref : (1, E, tq)       f32  raw query slab in NCHW layout (E sublanes, S lanes)
    kv_raw_ref: (1, E, S_pad)    f32  raw KV slab for the whole batch (resident across qi)
    w_ref     : (E, 3*E_pad)     bf16 [Wq*scale | Wk | Wv], input-major
    b_ref     : (1, 3*E_pad)     f32  [bq*scale | bk | bv]
    wo_ref    : (E, E_pad)       bf16 output-projection weight (output rows, padded inputs)
    bo_ref    : (E, 1)           f32  output-projection bias (per output channel)
    mask_ref  : (n_k, tk)        f32  additive key bias per kv chunk (0 real / -1e30 pad)
    o_ref     : (1, E, tq)       f32  output slab, already in (B, E, S) layout
    kvp_ref   : (S_pad, 2*E_pad) bf16 VMEM scratch holding the projected [K | V]
    """
    e_pad = wo_ref.shape[1]
    qi = pl.program_id(1)

    # ---- K/V projection: once per batch (first query tile), into resident VMEM scratch ---
    @pl.when(qi == 0)
    def _():
        xkv = kv_raw_ref[0].astype(jnp.bfloat16)                           # (E, S_pad)
        kv = jax.lax.dot_general(xkv, w_ref[:, e_pad:], (((0,), (0,)), ((), ())),
                                 preferred_element_type=jnp.float32)
        kv = kv + b_ref[:, e_pad:]                                         # (S_pad, 2*E_pad)
        kvp_ref[...] = kv.astype(jnp.bfloat16)

    # ---- Q projection for this query tile (1/sqrt(E) already folded into Wq / bq) --------
    xq = q_raw_ref[0].astype(jnp.bfloat16)                                 # (E, tq)
    q = jax.lax.dot_general(xq, w_ref[:, :e_pad], (((0,), (0,)), ((), ())),
                            preferred_element_type=jnp.float32)
    q = (q + b_ref[:, :e_pad]).astype(jnp.bfloat16)                        # (tq, E_pad)
    tq = q.shape[0]

    # ---- flash-style online softmax over the resident projected KV -----------------------
    def body(c, carry):
        m, l, acc = carry
        off = pl.multiple_of(c * tk, tk)
        k = kvp_ref[pl.ds(off, tk), :e_pad]                                # (tk, E_pad)
        v = kvp_ref[pl.ds(off, tk), e_pad:]                                # (tk, E_pad)
        s = jax.lax.dot_general(q, k, (((1,), (1,)), ((), ())),
                                preferred_element_type=jnp.float32)        # (tq, tk)
        if use_mask:
            s = s + mask_ref[pl.ds(c, 1), :]                               # (1, tk) bias row
        m_new = jnp.maximum(m, jnp.max(s, axis=-1, keepdims=True))
        alpha = jnp.exp(m - m_new)
        p = jnp.exp(s - m_new)
        l_new = alpha * l + jnp.sum(p, axis=-1, keepdims=True)
        acc_new = alpha * acc + jnp.dot(p.astype(jnp.bfloat16), v,
                                        preferred_element_type=jnp.float32)
        return m_new, l_new, acc_new

    m0 = jnp.full((tq, 1), -jnp.inf, jnp.float32)
    l0 = jnp.zeros((tq, 1), jnp.float32)
    acc0 = jnp.zeros((tq, e_pad), jnp.float32)
    m, l, acc = jax.lax.fori_loop(0, n_k, body, (m0, l0, acc0), unroll=bool(n_k <= 8))

    ctx = (acc / l).astype(jnp.bfloat16)                                   # (tq, E_pad)

    # ---- fused output projection, emitted directly in (E, S) layout ----------------------
    out_t = jax.lax.dot_general(wo_ref[...], ctx, (((1,), (1,)), ((), ())),
                                preferred_element_type=jnp.float32)        # (E, tq)
    o_ref[0] = (out_t + bo_ref[...]).astype(o_ref.dtype)


# ------------------------------------------------------------------------------- wrapper
def cross_atten_pallas(Q_nchw, KV_nchw, params):
    """Q_nchw, KV_nchw: (B, E, H, W) float32.  Returns (B, E, H, W) float32."""
    B, E, H, W = Q_nchw.shape
    S = H * W
    E_pad = _round_up(E, 128)

    # ---- tile selection (generation aware) ------------------------------------------------
    tq_target = 512
    tk_target = 128 if _is_older_tpu() else 512
    s128 = _round_up(S, 128)
    tq = s128 if s128 <= tq_target else tq_target
    S_pad = _round_up(S, tq)
    tk = min(tk_target, S_pad)
    assert S_pad % tq == 0 and S_pad % tk == 0
    n_q, n_k = S_pad // tq, S_pad // tk
    # TODO(synk): fall back to a kv-tiled grid axis (non-resident KV) if the per-batch
    # resident footprint (~E*S_pad*4 + S_pad*2*E_pad*2 bytes) ever exceeds the VMEM budget;
    # for this module (S = 20*40 = 800, E = 128) it is < 2 MiB.

    # ---- inputs stay in raw NCHW (B, E, S) layout; only pad S when needed -----------------
    Qs = Q_nchw.reshape(B, E, S)
    KVs = KV_nchw.reshape(B, E, S)
    if S_pad != S:
        pad = ((0, 0), (0, 0), (0, S_pad - S))
        Qs = jnp.pad(Qs, pad)
        KVs = jnp.pad(KVs, pad)

    # ---- parameters: tiny, padded/transposed once; 1/sqrt(E) folded into Wq, bq -----------
    scale = 1.0 / math.sqrt(E)

    def prep_w(w, s=1.0):          # PyTorch (out, in) -> (E, E_pad) input-major bf16
        return jnp.pad(w.T * s, ((0, 0), (0, E_pad - E))).astype(jnp.bfloat16)

    def prep_b(b, s=1.0):
        return jnp.pad(b * s, (0, E_pad - E)).reshape(1, E_pad).astype(jnp.float32)

    w_qkv = jnp.concatenate([prep_w(params["wq"], scale), prep_w(params["wk"]),
                             prep_w(params["wv"])], axis=1)                  # (E, 3*E_pad)
    b_qkv = jnp.concatenate([prep_b(params["bq"], scale), prep_b(params["bk"]),
                             prep_b(params["bv"])], axis=1)                  # (1, 3*E_pad)
    wo = jnp.pad(params["wo"], ((0, 0), (0, E_pad - E))).astype(jnp.bfloat16)  # (E, E_pad)
    bo = params["bo"].reshape(E, 1).astype(jnp.float32)                      # (E, 1)

    use_mask = S_pad != S
    key_idx = jnp.arange(S_pad, dtype=jnp.int32).reshape(n_k, tk)
    mask = jnp.where(key_idx < S, 0.0, -1e30).astype(jnp.float32)            # (n_k, tk)

    kern = functools.partial(_cross_atten_kernel, tk=tk, n_k=n_k, use_mask=use_mask)
    out = pl.pallas_call(
        kern,
        out_shape=jax.ShapeDtypeStruct((B, E, S_pad), jnp.float32),
        grid_spec=pltpu.PrefetchScalarGridSpec(
            num_scalar_prefetch=0,
            grid=(B, n_q),
            in_specs=[
                pl.BlockSpec((1, E, tq), lambda b, qi: (b, 0, qi)),       # raw Q tile
                pl.BlockSpec((1, E, S_pad), lambda b, qi: (b, 0, 0)),     # raw KV (resident)
                pl.BlockSpec((E, 3 * E_pad), lambda b, qi: (0, 0)),       # Wq|Wk|Wv
                pl.BlockSpec((1, 3 * E_pad), lambda b, qi: (0, 0)),       # bq|bk|bv
                pl.BlockSpec((E, E_pad), lambda b, qi: (0, 0)),           # Wo
                pl.BlockSpec((E, 1), lambda b, qi: (0, 0)),               # bo
                pl.BlockSpec((n_k, tk), lambda b, qi: (0, 0)),            # key mask bias
            ],
            out_specs=pl.BlockSpec((1, E, tq), lambda b, qi: (b, 0, qi)),
            scratch_shapes=[pltpu.VMEM((S_pad, 2 * E_pad), jnp.bfloat16)],
        ),
        compiler_params=pltpu.CompilerParams(
            # qi must stay "arbitrary": the qi == 0 step fills the per-batch KV scratch that
            # later q tiles of the same batch reuse.  The batch axis shards across megacore.
            dimension_semantics=("parallel", "arbitrary"),
            vmem_limit_bytes=_vmem_limit_bytes()),
    )(Qs, KVs, w_qkv, b_qkv, wo, bo, mask)

    if S_pad != S:
        out = out[:, :, :S]
    return out.reshape(B, E, H, W)


# ------------------------------------------------------------------------------- helpers
def init_params(key, embed_dim):
    """Deterministic synthetic init matching nn.MultiheadAttention parameter shapes."""
    ks = jax.random.split(key, 5)
    in_proj_w = jax.random.normal(ks[0], (3 * embed_dim, embed_dim), jnp.float32) * 0.05
    in_proj_b = jax.random.normal(ks[1], (3 * embed_dim,), jnp.float32) * 0.05
    out_proj_w = jax.random.normal(ks[2], (embed_dim, embed_dim), jnp.float32) * 0.05
    out_proj_b = jax.random.normal(ks[3], (embed_dim,), jnp.float32) * 0.05
    return {
        "wq": in_proj_w[0 * embed_dim:1 * embed_dim],
        "wk": in_proj_w[1 * embed_dim:2 * embed_dim],
        "wv": in_proj_w[2 * embed_dim:3 * embed_dim],
        "bq": in_proj_b[0 * embed_dim:1 * embed_dim],
        "bk": in_proj_b[1 * embed_dim:2 * embed_dim],
        "bv": in_proj_b[2 * embed_dim:3 * embed_dim],
        "wo": out_proj_w,
        "bo": out_proj_b,
    }


def _reference(Q_nchw, KV_nchw, params):
    """Pure-JAX f32 reference of the PyTorch forward."""
    B, E, H, W = Q_nchw.shape
    S = H * W
    Q = jnp.transpose(Q_nchw.reshape(B, E, S), (0, 2, 1))
    KV = jnp.transpose(KV_nchw.reshape(B, E, S), (0, 2, 1))
    q = Q @ params["wq"].T + params["bq"]
    k = KV @ params["wk"].T + params["bk"]
    v = KV @ params["wv"].T + params["bv"]
    scores = jnp.einsum("bqe,bke->bqk", q, k) / math.sqrt(E)
    attn = jax.nn.softmax(scores, axis=-1)
    ctx = jnp.einsum("bqk,bke->bqe", attn, v)
    out = ctx @ params["wo"].T + params["bo"]
    return jnp.transpose(out, (0, 2, 1)).reshape(B, E, H, W)


if __name__ == "__main__":
    key = jax.random.PRNGKey(0)
    k_q, k_kv, k_p = jax.random.split(key, 3)

    # Small shapes consistent with the module: embed_dim = i128 = 128, feature map H x W.
    B, i128, H, W = 2, 128, 8, 16          # S = H*W = 128 (no padding path)
    Q = jax.random.normal(k_q, (B, i128, H, W), jnp.float32)
    KV = jax.random.normal(k_kv, (B, i128, H, W), jnp.float32)
    params = init_params(k_p, i128)

    run = jax.jit(cross_atten_pallas)
    out = run(Q, KV, params)
    jax.block_until_ready(out)

    ref = _reference(Q, KV, params)
    assert out.shape == (B, i128, H, W)
    err = float(jnp.max(jnp.abs(out - ref)))
    assert err < 2e-2, f"max abs err {err}"   # bf16 MXU inputs, f32 accumulation

    # Second case exercising the generic path: E < 128 (lane padding) and S not 128-aligned
    # (padded-key mask bias inside the flash loop).
    B2, E2, H2, W2 = 2, 32, 5, 7            # S = 35
    Q2 = jax.random.normal(jax.random.PRNGKey(1), (B2, E2, H2, W2), jnp.float32)
    KV2 = jax.random.normal(jax.random.PRNGKey(2), (B2, E2, H2, W2), jnp.float32)
    params2 = init_params(jax.random.PRNGKey(3), E2)
    out2 = cross_atten_pallas(Q2, KV2, params2)
    jax.block_until_ready(out2)
    ref2 = _reference(Q2, KV2, params2)
    assert out2.shape == (B2, E2, H2, W2)
    err2 = float(jnp.max(jnp.abs(out2 - ref2)))
    assert err2 < 2e-2, f"max abs err {err2}"

    print("KERNEL_OK")
</pallas_src>

<mosaic_0001>
module attributes {stable_mosaic.version = 11 : i64} {
  func.func @_cross_atten_kernel(%arg0: i32, %arg1: i32, %arg2: memref<1x128x128xf32, #tpu.memory_space<vmem>>, %arg3: memref<1x128x128xf32, #tpu.memory_space<vmem>>, %arg4: memref<128x384xbf16, #tpu.memory_space<vmem>>, %arg5: memref<1x384xf32, #tpu.memory_space<vmem>>, %arg6: memref<128x128xbf16, #tpu.memory_space<vmem>>, %arg7: memref<128x1xf32, #tpu.memory_space<vmem>>, %arg8: memref<1x128xf32, #tpu.memory_space<vmem>>, %arg9: memref<1x128x128xf32, #tpu.memory_space<vmem>>, %arg10: memref<128x256xbf16, #tpu.memory_space<vmem>>) attributes {dimension_semantics = [#tpu.dimension_semantics<parallel>, #tpu.dimension_semantics<arbitrary>], iteration_bounds = array<i64: 2, 1>, scalar_prefetch = 0 : i64, scratch_operands = 1 : i64, tpu.core_type = #tpu.core_type<tc>, window_params = [{transform_indices = @transform_0, window_bounds = array<i64: 1, 128, 128>}, {transform_indices = @transform_1, window_bounds = array<i64: 1, 128, 128>}, {pipeline_mode = #tpu.pipeline_mode<synchronous>, transform_indices = @transform_2, window_bounds = array<i64: 128, 384>}, {pipeline_mode = #tpu.pipeline_mode<synchronous>, transform_indices = @transform_3, window_bounds = array<i64: 1, 384>}, {pipeline_mode = #tpu.pipeline_mode<synchronous>, transform_indices = @transform_4, window_bounds = array<i64: 128, 128>}, {pipeline_mode = #tpu.pipeline_mode<synchronous>, transform_indices = @transform_5, window_bounds = array<i64: 128, 1>}, {pipeline_mode = #tpu.pipeline_mode<synchronous>, transform_indices = @transform_6, window_bounds = array<i64: 1, 128>}, {transform_indices = @transform_7, window_bounds = array<i64: 1, 128, 128>}]} {
    %c0_i32 = arith.constant 0 : i32
    %0 = arith.cmpi eq, %arg1, %c0_i32 : i32
    %1 = arith.extui %0 : i1 to i32
    %c0_i32_0 = arith.constant 0 : i32
    %2 = arith.cmpi ne, %1, %c0_i32_0 : i32
    scf.if %2 {
      %c0_24 = arith.constant 0 : index
      %c0_25 = arith.constant 0 : index
      %c0_26 = arith.constant 0 : index
      %50 = vector.load %arg3[%c0_24, %c0_25, %c0_26] : memref<1x128x128xf32, #tpu.memory_space<vmem>>, vector<1x128x128xf32>
      %51 = vector.shape_cast %50 : vector<1x128x128xf32> to vector<128x128xf32>
      %52 = arith.truncf %51 : vector<128x128xf32> to vector<128x128xbf16>
      %c0_27 = arith.constant 0 : index
      %c128_28 = arith.constant 128 : index
      %53 = vector.load %arg4[%c0_27, %c128_28] : memref<128x384xbf16, #tpu.memory_space<vmem>>, vector<128x256xbf16>
      %cst_29 = arith.constant dense<0.000000e+00> : vector<128x256xf32>
      %54 = tpu.matmul %52, %53, %cst_29 {dimension_numbers = #tpu.dot_dimension_numbers<[0], [0], [1], [1], [0, 1, 1, 1], [], []>} : vector<128x128xbf16>, vector<128x256xbf16>, vector<128x256xf32> -> vector<128x256xf32>
      %c0_30 = arith.constant 0 : index
      %c128_31 = arith.constant 128 : index
      %55 = vector.load %arg5[%c0_30, %c128_31] : memref<1x384xf32, #tpu.memory_space<vmem>>, vector<1x256xf32>
      %56 = vector.broadcast %55 : vector<1x256xf32> to vector<128x256xf32>
      %57 = arith.addf %54, %56 : vector<128x256xf32>
      %58 = arith.truncf %57 : vector<128x256xf32> to vector<128x256xbf16>
      %c0_32 = arith.constant 0 : index
      %c0_33 = arith.constant 0 : index
      %59 = vector.load %arg10[%c0_32, %c0_33] : memref<128x256xbf16, #tpu.memory_space<vmem>>, vector<128x256xbf16>
      tpu.vector_store %arg10[%c0_32, %c0_33], %58 {strides = array<i32>} : memref<128x256xbf16, #tpu.memory_space<vmem>>, vector<128x256xbf16>,
    } else {
    }
    %c0 = arith.constant 0 : index
    %c0_1 = arith.constant 0 : index
    %c0_2 = arith.constant 0 : index
    %3 = vector.load %arg2[%c0, %c0_1, %c0_2] : memref<1x128x128xf32, #tpu.memory_space<vmem>>, vector<1x128x128xf32>
    %4 = vector.shape_cast %3 : vector<1x128x128xf32> to vector<128x128xf32>
    %5 = arith.truncf %4 : vector<128x128xf32> to vector<128x128xbf16>
    %c0_3 = arith.constant 0 : index
    %c0_4 = arith.constant 0 : index
    %6 = vector.load %arg4[%c0_3, %c0_4] : memref<128x384xbf16, #tpu.memory_space<vmem>>, vector<128x128xbf16>
    %cst = arith.constant dense<0.000000e+00> : vector<128x128xf32>
    %7 = tpu.matmul %5, %6, %cst {dimension_numbers = #tpu.dot_dimension_numbers<[0], [0], [1], [1], [0, 1, 1, 1], [], []>} : vector<128x128xbf16>, vector<128x128xbf16>, vector<128x128xf32> -> vector<128x128xf32>
    %c0_5 = arith.constant 0 : index
    %c0_6 = arith.constant 0 : index
    %8 = vector.load %arg5[%c0_5, %c0_6] : memref<1x384xf32, #tpu.memory_space<vmem>>, vector<1x128xf32>
    %9 = vector.broadcast %8 : vector<1x128xf32> to vector<128x128xf32>
    %10 = arith.addf %7, %9 : vector<128x128xf32>
    %11 = arith.truncf %10 : vector<128x128xf32> to vector<128x128xbf16>
    %cst_7 = arith.constant 0xFF800000 : f32
    %12 = vector.broadcast %cst_7 : f32 to vector<128x1xf32>
    %cst_8 = arith.constant 0.000000e+00 : f32
    %13 = vector.broadcast %cst_8 : f32 to vector<128x1xf32>
    %cst_9 = arith.constant 0.000000e+00 : f32
    %14 = vector.broadcast %cst_9 : f32 to vector<128x128xf32>
    %c0_i32_10 = arith.constant 0 : i32
    %c128_i32 = arith.constant 128 : i32
    %15 = arith.muli %c0_i32_10, %c128_i32 : i32
    %16 = tpu.assume_multiple %15, 128 : i32
    %17 = arith.index_cast %16 : i32 to index
    %c0_11 = arith.constant 0 : index
    %18 = vector.load %arg10[%17, %c0_11] : memref<128x256xbf16, #tpu.memory_space<vmem>>, vector<128x128xbf16>
    %19 = arith.index_cast %16 : i32 to index
    %c128 = arith.constant 128 : index
    %20 = vector.load %arg10[%19, %c128] : memref<128x256xbf16, #tpu.memory_space<vmem>>, vector<128x128xbf16>
    %cst_12 = arith.constant dense<0.000000e+00> : vector<128x128xf32>
    %21 = tpu.matmul %11, %18, %cst_12 {dimension_numbers = #tpu.dot_dimension_numbers<[1], [1], [0], [0], [0, 0, 1, 0], [], []>} : vector<128x128xbf16>, vector<128x128xbf16>, vector<128x128xf32> -> vector<128x128xf32>
    %cst_13 = arith.constant dense<0xFF800000> : vector<128xf32>
    %22 = vector.multi_reduction <maximumf>, %21, %cst_13 [1] : vector<128x128xf32> to vector<128xf32>
    %23 = vector.shape_cast %22 : vector<128xf32> to vector<128x1xf32>
    %24 = arith.maximumf %12, %23 : vector<128x1xf32>
    %25 = arith.subf %12, %24 : vector<128x1xf32>
    %26 = math.exp %25 : vector<128x1xf32>
    %27 = vector.broadcast %24 : vector<128x1xf32> to vector<128x128xf32>
    %28 = arith.subf %21, %27 : vector<128x128xf32>
    %29 = math.exp %28 : vector<128x128xf32>
    %30 = arith.mulf %26, %13 : vector<128x1xf32>
    %cst_14 = arith.constant dense<0.000000e+00> : vector<128xf32>
    %31 = vector.multi_reduction <add>, %29, %cst_14 [1] : vector<128x128xf32> to vector<128xf32>
    %32 = vector.shape_cast %31 : vector<128xf32> to vector<128x1xf32>
    %33 = arith.addf %30, %32 : vector<128x1xf32>
    %34 = vector.broadcast %26 : vector<128x1xf32> to vector<128x128xf32>
    %35 = arith.mulf %34, %14 : vector<128x128xf32>
    %36 = arith.truncf %29 : vector<128x128xf32> to vector<128x128xbf16>
    %cst_15 = arith.constant dense<0.000000e+00> : vector<128x128xf32>
    %37 = tpu.matmul %36, %20, %cst_15 {dimension_numbers = #tpu.dot_dimension_numbers<[1], [0], [0], [1], [0, 0, 1, 1], [], []>} : vector<128x128xbf16>, vector<128x128xbf16>, vector<128x128xf32> -> vector<128x128xf32>
    %38 = arith.addf %35, %37 : vector<128x128xf32>
    %c1_i32 = arith.constant 1 : i32
    %39 = vector.broadcast %33 : vector<128x1xf32> to vector<128x128xf32>
    %40 = arith.divf %38, %39 : vector<128x128xf32>
    %41 = arith.truncf %40 : vector<128x128xf32> to vector<128x128xbf16>
    %c0_16 = arith.constant 0 : index
    %c0_17 = arith.constant 0 : index
    %42 = vector.load %arg6[%c0_16, %c0_17] : memref<128x128xbf16, #tpu.memory_space<vmem>>, vector<128x128xbf16>
    %cst_18 = arith.constant dense<0.000000e+00> : vector<128x128xf32>
    %43 = tpu.matmul %42, %41, %cst_18 {dimension_numbers = #tpu.dot_dimension_numbers<[1], [1], [0], [0], [0, 0, 1, 0], [], []>} : vector<128x128xbf16>, vector<128x128xbf16>, vector<128x128xf32> -> vector<128x128xf32>
    %c0_19 = arith.constant 0 : index
    %c0_20 = arith.constant 0 : index
    %44 = vector.load %arg7[%c0_19, %c0_20] : memref<128x1xf32, #tpu.memory_space<vmem>>, vector<128x1xf32>
    %45 = vector.broadcast %44 : vector<128x1xf32> to vector<128x128xf32>
    %46 = arith.addf %43, %45 : vector<128x128xf32>
    %c0_21 = arith.constant 0 : index
    %c0_22 = arith.constant 0 : index
    %c0_23 = arith.constant 0 : index
    %47 = vector.load %arg9[%c0_21, %c0_22, %c0_23] : memref<1x128x128xf32, #tpu.memory_space<vmem>>, vector<1x128x128xf32>
    %48 = vector.shape_cast %47 : vector<1x128x128xf32> to vector<128x128xf32>
    %49 = vector.shape_cast %46 : vector<128x128xf32> to vector<1x128x128xf32>
    tpu.vector_store %arg9[%c0_21, %c0_22, %c0_23], %49 {strides = array<i32>} : memref<1x128x128xf32, #tpu.memory_space<vmem>>, vector<1x128x128xf32>,
    return
  }
  func.func @transform_0(%arg0: i32, %arg1: i32) -> (i32, i32, i32) {
    %c0_i32 = arith.constant 0 : i32
    %c0_i32_0 = arith.constant 0 : i32
    return %arg0, %c0_i32, %arg1 : i32, i32, i32
  }
  func.func @transform_1(%arg0: i32, %arg1: i32) -> (i32, i32, i32) {
    %c0_i32 = arith.constant 0 : i32
    %c0_i32_0 = arith.constant 0 : i32
    %c0_i32_1 = arith.constant 0 : i32
    return %arg0, %c0_i32, %c0_i32_0 : i32, i32, i32
  }
  func.func @transform_2(%arg0: i32, %arg1: i32) -> (i32, i32) {
    %c0_i32 = arith.constant 0 : i32
    %c0_i32_0 = arith.constant 0 : i32
    %c0_i32_1 = arith.constant 0 : i32
    return %c0_i32, %c0_i32_0 : i32, i32
  }
  func.func @transform_3(%arg0: i32, %arg1: i32) -> (i32, i32) {
    %c0_i32 = arith.constant 0 : i32
    %c0_i32_0 = arith.constant 0 : i32
    %c0_i32_1 = arith.constant 0 : i32
    return %c0_i32, %c0_i32_0 : i32, i32
  }
  func.func @transform_4(%arg0: i32, %arg1: i32) -> (i32, i32) {
    %c0_i32 = arith.constant 0 : i32
    %c0_i32_0 = arith.constant 0 : i32
    %c0_i32_1 = arith.constant 0 : i32
    return %c0_i32, %c0_i32_0 : i32, i32
  }
  func.func @transform_5(%arg0: i32, %arg1: i32) -> (i32, i32) {
    %c0_i32 = arith.constant 0 : i32
    %c0_i32_0 = arith.constant 0 : i32
    %c0_i32_1 = arith.constant 0 : i32
    return %c0_i32, %c0_i32_0 : i32, i32
  }
  func.func @transform_6(%arg0: i32, %arg1: i32) -> (i32, i32) {
    %c0_i32 = arith.constant 0 : i32
    %c0_i32_0 = arith.constant 0 : i32
    %c0_i32_1 = arith.constant 0 : i32
    return %c0_i32, %c0_i32_0 : i32, i32
  }
  func.func @transform_7(%arg0: i32, %arg1: i32) -> (i32, i32, i32) {
    %c0_i32 = arith.constant 0 : i32
    %c0_i32_0 = arith.constant 0 : i32
    return %arg0, %c0_i32, %arg1 : i32, i32, i32
  }
}

</mosaic_0001>

<bundles_post_ra>
// kernel: cross_atten_pallas.1
= control target key start
LH: loop header
LB: loop body
LE: loop exit
PB: predicated region body
PF: predicated region fallthrough
CT: control target
= control target key end

     0   :  { %s2406_s24 = smov 0   ;;  %s2408_s25 = smov 0   ;;  %s2904_s0 = inlined_call_operand.vmem [shape: f32[2,128,128], index: 0, kind: input, shape index: {}]   ;;  %s2905_s1 = inlined_call_operand.vmem [shape: f32[2,128,128], index: 1, kind: input, shape index: {}]   ;;  %s2906_s2 = inlined_call_operand.vmem [shape: bf16[128,384], index: 2, kind: input, shape index: {}]   ;;  %s2907_s3 = inlined_call_operand.vmem [shape: f32[1,384], index: 3, kind: input, shape index: {}]   ;;  %s2908_s4 = inlined_call_operand.vmem [shape: bf16[128,128], index: 4, kind: input, shape index: {}]   ;;  %s2909_s5 = inlined_call_operand.vmem [shape: f32[128,1], index: 5, kind: input, shape index: {}]   ;;  %s2910_s6 = inlined_call_operand.vmem [shape: f32[1,128], index: 6, kind: input, shape index: {}]   ;;  %s2911_s7 = inlined_call_operand.vmem [shape: f32[2,128,128], index: 7, kind: output, shape index: {}]  }
   0x1   :  { %s2410_s26 = smov 0  }
   0x2 LB: > { %s29_s6 = sadd.s32 1, %s2359_s25  ;;  %p1877_p0 = scmp.ge.s32.totalorder %s2363_s26, 1  ;;  %s2363_s26 = sphi %s2410_s26, %s17_s26   ;;  %s2359_s25 = sphi %s2408_s25, %s2913_s25   ;;  %s2355_s24 = sphi %s2406_s24, %s2912_s24  }
   0x3   : > { %p31_p1 = scmp.ge.s32.totalorder %s29_s6, 2  ;;  %p266_p2 = scmp.lt.s32.totalorder %s2363_s26, 3 }
   0x5   : > { %s2915_s6 = smov (%p31_p1, %s29_s6), 0  ;;  %p267_p3 = pnand %p1877_p0, %p266_p2 }
   0x6   : > { %p309_p4 = scmp.lt.s32.totalorder (!%p267_p3), %s2355_s24, 1 }
   0x7   : > { %270 = sbr.rel (%p267_p3) target bundleno = 1326 (0x52e), region = 48 }
   0xc   : > { %v2189_v0 = vld [vmem:[%s2906_s2 + $0xb0] ss:$12 sps:$4 sm:$0xff]   ;;  %v2191_v1 = vld [vmem:[%s2906_s2 + $0xac] ss:$12 sps:$4 sm:$0xff]   ;;  %v2365_v2 = vmov 0   ;;  %s2917_s24 = smov (!%p309_p4, %s2355_s24), 1 }
   0xd   : > { %515 = vmatprep.mubr.bf16.mxu0 %v2365_v2  ;;  %483 = vmatprep.subr.bf16.mxu0 %v2189_v0  ;;  %v2192_v3 = vld [vmem:[%s2906_s2 + $0x98] ss:$12 sps:$4 sm:$0xff]   ;;  %v2194_v4 = vld [vmem:[%s2906_s2 + $0x94] ss:$12 sps:$4 sm:$0xff]   ;;  %s2437_s12 = sshll.u32 %s2917_s24, 7 }
   0xe   : > { %484 = vmatpush1.bf16.msra.mxu0 %v2191_v1  ;;  %v2195_v5 = vld [vmem:[%s2906_s2 + $0x80] ss:$12 sps:$4 sm:$0xff]   ;;  %s2446_s17 = scalar_lea.vmem %s2905_s1, %s2437_s12  ;;  %v2197_v11 = vld [vmem:[%s2906_s2 + $0x7c] ss:$12 sps:$4 sm:$0xff]   ;;  %v2200_v16 = vld [vmem:[%s2906_s2 + $0x64] ss:$12 sps:$4 sm:$0xff]   ;;  %s2470_s30 = scalar_lea.vmem %s2904_s0, %s2437_s12 }
   0xf   : > { %485 = vmatprep.subr.bf16.mxu0 %v2192_v3  ;;  %v335_v6 = vld [vmem:[%s2446_s17] sm:$0xff]  ;;  %v336_v7 = vld [vmem:[%s2446_s17 + $0x8] sm:$0xff]  ;;  %v337_v8 = vld [vmem:[%s2446_s17 + $0x10] sm:$0xff]  ;;  %s2877_s13 = scalar_lea.vmem %s2911_s7, %s2437_s12 }
  0x10   : > { %v351_v9 = vpack.c.bf16 %v336_v7, %v335_v6  ;;  %v338_v10 = vld [vmem:[%s2446_s17 + $0x18] sm:$0xff]  ;;  %v2198_v12 = vld [vmem:[%s2906_s2 + $0x68] ss:$12 sps:$4 sm:$0xff]   ;;  %v339_v14 = vld [vmem:[%s2446_s17 + $0x20] sm:$0xff] }
  0x11   : > { %v352_v13 = vpack.c.bf16 %v338_v10, %v337_v8  ;;  %v340_v15 = vld [vmem:[%s2446_s17 + $0x28] sm:$0xff]  ;;  %v2201_v17 = vld [vmem:[%s2906_s2 + $0x50] ss:$12 sps:$4 sm:$0xff]   ;;  %v2204_v22 = vld [vmem:[%s2906_s2 + $0x38] ss:$12 sps:$4 sm:$0xff]  }
  0x12   : > { %486 = vmatpush1.bf16.msra.mxu0 %v2194_v4  ;;  %387 = vxpose.xlu0.c.b16.start [1/8] %v351_v9, 128  ;;  %v353_v18 = vpack.c.bf16 %v340_v15, %v339_v14  ;;  %v341_v19 = vld [vmem:[%s2446_s17 + $0x30] sm:$0xff]  ;;  %v342_v20 = vld [vmem:[%s2446_s17 + $0x38] sm:$0xff]  ;;  %v708_v23 = vld [vmem:[%s2470_s30] sm:$0xff] }
  0x13   : > { %487 = vmatprep.subr.bf16.mxu0 %v2195_v5  ;;  %v2203_v21 = vld [vmem:[%s2906_s2 + $0x4c] ss:$12 sps:$4 sm:$0xff]   ;;  %v710_v25 = vld [vmem:[%s2470_s30 + $0x10] sm:$0xff]  ;;  %v354_v26 = vpack.c.bf16 %v342_v20, %v341_v19  ;;  %v343_v29 = vld [vmem:[%s2446_s17 + $0x40] sm:$0xff] }
  0x14   : > { %v709_v24 = vld [vmem:[%s2470_s30 + $0x8] sm:$0xff]  ;;  %v711_v28 = vld [vmem:[%s2470_s30 + $0x18] sm:$0xff]  ;;  %v2206_v31 = vld [vmem:[%s2906_s2 + $0x34] ss:$12 sps:$4 sm:$0xff]  }
  0x15   : > { %v724_v27 = vpack.c.bf16 %v709_v24, %v708_v23  ;;  %v344_v30 = vld [vmem:[%s2446_s17 + $0x48] sm:$0xff]  ;;  %v725_v33 = vpack.c.bf16 %v711_v28, %v710_v25  ;;  %v345_v34 = vld [vmem:[%s2446_s17 + $0x50] sm:$0xff]  ;;  %v346_v35 = vld [vmem:[%s2446_s17 + $0x58] sm:$0xff] }
  0x16   : > { %488 = vmatpush1.bf16.msra.mxu0 %v2197_v11  ;;  %388 = vxpose.xlu0.c.b16.cont [2/8] %v352_v13, 128  ;;  %v2207_v32 = vld [vmem:[%s2906_s2 + $0x20] ss:$12 sps:$4 sm:$0xff]   ;;  %v355_v38 = vpack.c.bf16 %v344_v30, %v343_v29  ;;  %v2209_v39 = vld [vmem:[%s2906_s2 + $0x1c] ss:$12 sps:$4 sm:$0xff]   ;;  %v714_v44 = vld [vmem:[%s2470_s30 + $0x30] sm:$0xff]  ;;  %v356_v46 = vpack.c.bf16 %v346_v35, %v345_v34 }
  0x17   : > { %489 = vmatprep.subr.bf16.mxu0 %v2198_v12  ;;  %755 = vxpose.xlu1.c.b16.start [1/8] %v724_v27, 128  ;;  %v712_v36 = vld [vmem:[%s2470_s30 + $0x20] sm:$0xff]  ;;  %v713_v37 = vld [vmem:[%s2470_s30 + $0x28] sm:$0xff]  ;;  %v715_v45 = vld [vmem:[%s2470_s30 + $0x38] sm:$0xff] }
  0x18   : > { %v2210_v40 = vld [vmem:[%s2906_s2 + $0x8] ss:$12 sps:$4 sm:$0xff]   ;;  %v726_v41 = vpack.c.bf16 %v713_v37, %v712_v36  ;;  %v347_v42 = vld [vmem:[%s2446_s17 + $0x60] sm:$0xff]  ;;  %v727_v50 = vpack.c.bf16 %v715_v45, %v714_v44  ;;  %v350_v52 = vld [vmem:[%s2446_s17 + $0x78] sm:$0xff] }
  0x19   : > { %v348_v43 = vld [vmem:[%s2446_s17 + $0x68] sm:$0xff]  ;;  %v2212_v47 = vld [vmem:[%s2906_s2 + $0x4] ss:$12 sps:$4 sm:$0xff]   ;;  %v719_v56 = vld [vmem:[%s2470_s30 + $0x58] sm:$0xff] }
  0x1a   : > { %490 = vmatpush1.bf16.msra.mxu0 %v2200_v16  ;;  %389 = vxpose.xlu0.c.b16.cont [3/8] %v353_v18, 128  ;;  %v716_v48 = vld [vmem:[%s2470_s30 + $0x40] sm:$0xff]  ;;  %v717_v49 = vld [vmem:[%s2470_s30 + $0x48] sm:$0xff]  ;;  %v349_v51 = vld [vmem:[%s2446_s17 + $0x70] sm:$0xff]  ;;  %v357_v53 = vpack.c.bf16 %v348_v43, %v347_v42 }
  0x1b   : > { %491 = vmatprep.subr.bf16.mxu0 %v2201_v17  ;;  %756 = vxpose.xlu1.c.b16.cont [2/8] %v725_v33, 128  ;;  %v728_v54 = vpack.c.bf16 %v717_v49, %v716_v48  ;;  %v718_v55 = vld [vmem:[%s2470_s30 + $0x50] sm:$0xff]  ;;  %v358_v57 = vpack.c.bf16 %v350_v52, %v349_v51  ;;  %v720_v59 = vld [vmem:[%s2470_s30 + $0x60] sm:$0xff]  ;;  %v721_v60 = vld [vmem:[%s2470_s30 + $0x68] sm:$0xff] }
  0x1c   : > { %v729_v58 = vpack.c.bf16 %v719_v56, %v718_v55  ;;  %v2213_v61 = vld [vmem:[%s2906_s2 + $0xa8] ss:$12 sps:$4 sm:$0xff]   ;;  %v2214_v62 = vld [vmem:[%s2906_s2 + $0x90] ss:$12 sps:$4 sm:$0xff]   ;;  %v730_v63 = vpack.c.bf16 %v721_v60, %v720_v59  ;;  %v2215_v3 = vld [vmem:[%s2906_s2 + $0x78] ss:$12 sps:$4 sm:$0xff]  }
  0x1d   : > { %2034 = vmatprep.subr.bf16.mxu1 %v2213_v61  ;;  %v722_v0 = vld [vmem:[%s2470_s30 + $0x70] sm:$0xff]  ;;  %v723_v1 = vld [vmem:[%s2470_s30 + $0x78] sm:$0xff]  ;;  %v2216_v5 = vld [vmem:[%s2906_s2 + $0x60] ss:$12 sps:$4 sm:$0xff]  }
  0x1e   : > { %492 = vmatpush1.bf16.msra.mxu0 %v2203_v21  ;;  %390 = vxpose.xlu0.c.b16.cont [4/8] %v354_v26, 128  ;;  %v731_v4 = vpack.c.bf16 %v723_v1, %v722_v0  ;;  %v2217_v6 = vld [vmem:[%s2906_s2 + $0x48] ss:$12 sps:$4 sm:$0xff]   ;;  %v2218_v7 = vld [vmem:[%s2906_s2 + $0x30] ss:$12 sps:$4 sm:$0xff]   ;;  %v2219_v8 = vld [vmem:[%s2906_s2 + $0x18] ss:$12 sps:$4 sm:$0xff]   ;;  %v377_v26 = vlaneseq }
  0x1f   : > { %493 = vmatprep.subr.bf16.mxu0 %v2204_v22  ;;  %757 = vxpose.xlu1.c.b16.cont [3/8] %v726_v41, 128  ;;  %v2220_v9 = vld [vmem:[%s2906_s2] ss:$12 sps:$4 sm:$0xff]  }
  0x20   : > { %2035 = vmatpush3.bf16.msra.mxu1 %v2213_v61  ;;  %v378_v27 = vshrl.u32 %v377_v26, 7  ;;  %v375_v30 = vld [vmem:[%s2907_s3 + $0x1] sm:$0x3] }
  0x21   : > { %2036 = vmatprep.subr.bf16.mxu1 %v2214_v62 }
  0x22   : > { %494 = vmatpush1.bf16.msra.mxu0 %v2206_v31  ;;  %391 = vxpose.xlu0.c.b16.cont [5/8] %v355_v38, 128  ;;  %v379_v28 = vsub.s32 0, %v378_v27  ;;  %v383_v29 = vsub.s32 1, %v378_v27 }
  0x23   : > { %495 = vmatprep.subr.bf16.mxu0 %v2207_v32  ;;  %758 = vxpose.xlu1.c.b16.cont [4/8] %v727_v50, 128 }
  0x24   : > { %2037 = vmatpush3.bf16.msra.mxu1 %v2214_v62  ;;  %v2555_v31 = vrot.slane %v375_v30, %v379_v28  ;;  %v2557_v32 = vrot.slane %v375_v30, %v383_v29 }
  0x25   : > { %2038 = vmatprep.subr.bf16.mxu1 %v2215_v3 }
  0x26   : > { %496 = vmatpush1.bf16.msra.mxu0 %v2209_v39  ;;  %392 = vxpose.xlu0.c.b16.cont [6/8] %v356_v46, 128 }
  0x27   : > { %497 = vmatprep.subr.bf16.mxu0 %v2210_v40  ;;  %759 = vxpose.xlu1.c.b16.cont [5/8] %v728_v54, 128 }
  0x28   : > { %2039 = vmatpush3.bf16.msra.mxu1 %v2215_v3 }
  0x29   : > { %2040 = vmatprep.subr.bf16.mxu1 %v2216_v5 }
  0x2a   : > { %498 = vmatpush1.bf16.msra.mxu0 %v2212_v47  ;;  %393 = vxpose.xlu0.c.b16.cont [7/8] %v357_v53, 128  ;;  %v2568_v47 = vld [vmem:[%s2907_s3] ss:$0 sm:$0xff] }
  0x2b   : > { %760 = vxpose.xlu1.c.b16.cont [6/8] %v729_v58, 128 }
  0x2c   : > { %2041 = vmatpush3.bf16.msra.mxu1 %v2216_v5 }
  0x2d   : > { %2042 = vmatprep.subr.bf16.mxu1 %v2217_v6 }
  0x2e   : > { %394 = vxpose.xlu0.c.b16.end [8/8] %v358_v57, 128 }
  0x2f   : > { %761 = vxpose.xlu1.c.b16.cont [7/8] %v730_v63, 128 }
  0x30   : > { %2043 = vmatpush3.bf16.msra.mxu1 %v2217_v6 }
  0x31   : > { %2044 = vmatprep.subr.bf16.mxu1 %v2218_v7 }
  0x33   : > { %762 = vxpose.xlu1.c.b16.end [8/8] %v731_v4, 128 }
  0x34   : > { %2045 = vmatpush3.bf16.msra.mxu1 %v2218_v7 }
  0x35   : > { %2046 = vmatprep.subr.bf16.mxu1 %v2219_v8 }
  0x37   : > { %2187 = vset.pattern.permute.xlu0 %v2365_v2  ;;  %2188 = vset.pattern.permute.xlu1 %v2365_v2 }
  0x38   : > { %2047 = vmatpush3.bf16.msra.mxu1 %v2219_v8 }
  0x39   : > { %2048 = vmatprep.subr.bf16.mxu1 %v2220_v9 }
  0x3c   : > { %2049 = vmatpush3.bf16.msra.mxu1 %v2220_v9 }
  0x74   : > { %v395_v10 = vpop.trf.xlu0 }
  0x75   : > { %516 = vmatmul.mubr.bf16.vlgmr.msra.gmra.mxu0 %v395_v10 }
  0x76   : > { %525 = vmatprep.mubr.bf16.mxu0 %v2365_v2 }
  0x78   : > { %v396_v11 = vpop.trf.xlu0 }
  0x79   : > { %v763_v12 = vpop.trf.xlu1 }
  0x7a   : > { %2050 = vmatprep.mubr.bf16.mxu1 %v763_v12 }
  0x7c   : > { %v397_v13 = vpop.trf.xlu0 }
  0x7d   : > { %526 = vmatmul.mubr.bf16.gmra.mxu0 %v396_v11  ;;  %v764_v14 = vpop.trf.xlu1 }
  0x7e   : > { %535 = vmatprep.mubr.bf16.mxu0 %v2365_v2  ;;  %2051 = vmatmul.mubr.bf16.vlgmr.msra.gmra.mxu1 %v764_v14 }
  0x80   : > { %v398_v16 = vpop.trf.xlu0 }
  0x81   : > { %v765_v15 = vpop.trf.xlu1 }
  0x82   : > { %2054 = vmatprep.mubr.bf16.mxu1 %v765_v15 }
  0x84   : > { %v399_v19 = vpop.trf.xlu0 }
  0x85   : > { %536 = vmatmul.mubr.bf16.gmra.mxu0 %v397_v13  ;;  %v766_v17 = vpop.trf.xlu1 }
  0x86   : > { %545 = vmatprep.mubr.bf16.mxu0 %v2365_v2  ;;  %2055 = vmatmul.mubr.bf16.gmra.mxu1 %v766_v17 }
  0x88   : > { %v400_v22 = vpop.trf.xlu0 }
  0x89   : > { %v767_v18 = vpop.trf.xlu1 }
  0x8a   : > { %2058 = vmatprep.mubr.bf16.mxu1 %v767_v18 }
  0x8c   : > { %v401_v24 = vpop.trf.xlu0 }
  0x8d   : > { %546 = vmatmul.mubr.bf16.gmra.mxu0 %v398_v16  ;;  %v768_v20 = vpop.trf.xlu1 }
  0x8e   : > { %555 = vmatprep.mubr.bf16.mxu0 %v2365_v2  ;;  %2059 = vmatmul.mubr.bf16.gmra.mxu1 %v768_v20 }
  0x90   : > { %v402_v25 = vpop.trf.xlu0 }
  0x91   : > { %v769_v21 = vpop.trf.xlu1 }
  0x92   : > { %2062 = vmatprep.mubr.bf16.mxu1 %v769_v21 }
  0x95   : > { %556 = vmatmul.mubr.bf16.gmra.mxu0 %v399_v19  ;;  %v770_v23 = vpop.trf.xlu1 }
  0x96   : > { %565 = vmatprep.mubr.bf16.mxu0 %v2365_v2  ;;  %2063 = vmatmul.mubr.bf16.gmra.mxu1 %v770_v23 }
  0x9d   : > { %566 = vmatmul.mubr.bf16.gmra.mxu0 %v400_v22 }
  0x9e   : > { %575 = vmatprep.mubr.bf16.mxu0 %v2365_v2 }
  0xa5   : > { %576 = vmatmul.mubr.bf16.gmra.mxu0 %v401_v24 }
  0xa6   : > { %585 = vmatprep.mubr.bf16.mxu0 %v2365_v2 }
  0xad   : > { %586 = vmatmul.mubr.bf16.gmra.mxu0 %v402_v25 }
 0x135   : > { %v517_v33 = vpop.f32.mrf.mxu0 }
 0x136   : > { %v518_v35 = vadd.f32 %v517_v33, %v2555_v31 }
 0x137   : > { %v519_v34 = vpop.f32.mrf.mxu0 }
 0x138   : > { %v520_v2 = vadd.f32 %v519_v34, %v2557_v32 }
 0x139   : > { %v521_v36 = vpop.f32.mrf.mxu0 }
 0x13a   : > { %v1954_v37 = vpack.c.bf16 %v520_v2, %v518_v35  ;;  %v522_v39 = vadd.f32 %v521_v36, %v2555_v31 }
 0x13b   : > { %v523_v38 = vpop.f32.mrf.mxu0 }
 0x13c   : > { %692 = vst [vmem:[#allocation2] sm:$0xff] %v1954_v37  ;;  %v524_v40 = vadd.f32 %v523_v38, %v2557_v32 }
 0x13d   : > { %v527_v41 = vpop.f32.mrf.mxu0 }
 0x13e   : > { %v1955_v42 = vpack.c.bf16 %v524_v40, %v522_v39  ;;  %v528_v44 = vadd.f32 %v527_v41, %v2555_v31  ;;  %v2052_v50 = vpop.f32.mrf.mxu1 }
 0x13f   : > { %v529_v43 = vpop.f32.mrf.mxu0  ;;  %v2573_v53 = vadd.f32 %v2052_v50, %v2568_v47 }
 0x140   : > { %693 = vst [vmem:[#allocation2 + $0x8] sm:$0xff] %v1955_v42  ;;  %v530_v45 = vadd.f32 %v529_v43, %v2557_v32  ;;  %v853_v55 = vpop.f32.mrf.mxu1 }
 0x141   : > { %v531_v46 = vpop.f32.mrf.mxu0  ;;  %v854_v61 = vadd.f32 %v2568_v47, %v853_v55 }
 0x142   : > { %v1956_v48 = vpack.c.bf16 %v530_v45, %v528_v44  ;;  %v532_v51 = vadd.f32 %v531_v46, %v2555_v31  ;;  %v2053_v58 = vpop.f32.mrf.mxu1 }
 0x143   : > { %v533_v49 = vpop.f32.mrf.mxu0  ;;  %v2579_v62 = vadd.f32 %v2053_v58, %v2568_v47 }
 0x144   : > { %694 = vst [vmem:[#allocation2 + $0x10] sm:$0xff] %v1956_v48  ;;  %v534_v52 = vadd.f32 %v533_v49, %v2557_v32  ;;  %v856_v0 = vpop.f32.mrf.mxu1 }
 0x145   : > { %v537_v54 = vpop.f32.mrf.mxu0  ;;  %v917_v3 = vpack.c.bf16 %v2579_v62, %v2573_v53  ;;  %v857_v4 = vadd.f32 %v2568_v47, %v856_v0 }
 0x146   : > { %v1957_v56 = vpack.c.bf16 %v534_v52, %v532_v51  ;;  %v538_v59 = vadd.f32 %v537_v54, %v2555_v31 }
 0x147   : > { %v539_v57 = vpop.f32.mrf.mxu0  ;;  %v916_v8 = vpack.c.bf16 %v857_v4, %v854_v61 }
 0x148   : > { %695 = vst [vmem:[#allocation2 + $0x18] sm:$0xff] %v1957_v56  ;;  %v540_v60 = vadd.f32 %v539_v57, %v2557_v32 }
 0x149   : > { %v541_v63 = vpop.f32.mrf.mxu0  ;;  %2082 = vmatprep.mubr.bf16.mxu0 %v916_v8 }
 0x14a   : > { %v1958_v1 = vpack.c.bf16 %v540_v60, %v538_v59  ;;  %v542_v6 = vadd.f32 %v541_v63, %v2555_v31 }
 0x14b   : > { %v543_v5 = vpop.f32.mrf.mxu0 }
 0x14c   : > { %696 = vst [vmem:[#allocation2 + $0x20] sm:$0xff] %v1958_v1  ;;  %v544_v7 = vadd.f32 %v543_v5, %v2557_v32 }
 0x14d   : > { %v547_v9 = vpop.f32.mrf.mxu0 }
 0x14e   : > { %v1959_v10 = vpack.c.bf16 %v544_v7, %v542_v6  ;;  %v548_v12 = vadd.f32 %v547_v9, %v2555_v31 }
 0x14f   : > { %v549_v11 = vpop.f32.mrf.mxu0 }
 0x150   : > { %697 = vst [vmem:[#allocation2 + $0x28] sm:$0xff] %v1959_v10  ;;  %v550_v13 = vadd.f32 %v549_v11, %v2557_v32  ;;  %v2231_v10 = vld [vmem:[#allocation2 + $0x14] ss:$8 sps:$4 sm:$0xff]  }
 0x151   : > { %v551_v14 = vpop.f32.mrf.mxu0 }
 0x152   : > { %v1960_v15 = vpack.c.bf16 %v550_v13, %v548_v12  ;;  %v552_v17 = vadd.f32 %v551_v14, %v2555_v31  ;;  %v2233_v12 = vld [vmem:[#allocation2 + $0x4] ss:$8 sps:$4 sm:$0xff]   ;;  %v2056_v13 = vpop.f32.mrf.mxu1 }
 0x153   : > { %v553_v16 = vpop.f32.mrf.mxu0 }
 0x154   : > { %698 = vst [vmem:[#allocation2 + $0x30] sm:$0xff] %v1960_v15  ;;  %v554_v18 = vadd.f32 %v553_v16, %v2557_v32  ;;  %v869_v14 = vpop.f32.mrf.mxu1 }
 0x155   : > { %v557_v19 = vpop.f32.mrf.mxu0 }
 0x156   : > { %v1961_v20 = vpack.c.bf16 %v554_v18, %v552_v17  ;;  %v558_v22 = vadd.f32 %v557_v19, %v2555_v31  ;;  %v2057_v16 = vpop.f32.mrf.mxu1  ;;  %v2235_v18 = vld [vmem:[#allocation2 + $0x10] ss:$8 sps:$4 sm:$0xff]  }
 0x157   : > { %v559_v21 = vpop.f32.mrf.mxu0  ;;  %v2230_v9 = vld [vmem:[#allocation2 + $0x24] ss:$8 sps:$4 sm:$0xff]   ;;  %v2234_v15 = vld [vmem:[#allocation2 + $0x20] ss:$8 sps:$4 sm:$0xff]  }
 0x158   : > { %699 = vst [vmem:[#allocation2 + $0x38] sm:$0xff] %v1961_v20  ;;  %v560_v23 = vadd.f32 %v559_v21, %v2557_v32  ;;  %v872_v17 = vpop.f32.mrf.mxu1  ;;  %v2236_v21 = vld [vmem:[#allocation2] ss:$8 sps:$4 sm:$0xff]  }
 0x159   : > { %v561_v24 = vpop.f32.mrf.mxu0 }
 0x15a   : > { %v1962_v25 = vpack.c.bf16 %v560_v23, %v558_v22  ;;  %v562_v27 = vadd.f32 %v561_v24, %v2555_v31  ;;  %v2060_v19 = vpop.f32.mrf.mxu1  ;;  %v870_v24 = vadd.f32 %v2568_v47, %v869_v14 }
 0x15b   : > { %v563_v26 = vpop.f32.mrf.mxu0  ;;  %v894_v62 = vadd.f32 %v2060_v19, %v2568_v47 }
 0x15c   : > { %700 = vst [vmem:[#allocation2 + $0x40] sm:$0xff] %v1962_v25  ;;  %v564_v28 = vadd.f32 %v563_v26, %v2557_v32  ;;  %v885_v20 = vpop.f32.mrf.mxu1  ;;  %v873_v25 = vadd.f32 %v2568_v47, %v872_v17 }
 0x15d   : > { %v567_v29 = vpop.f32.mrf.mxu0 }
 0x15e   : > { %v1963_v30 = vpack.c.bf16 %v564_v28, %v562_v27  ;;  %v568_v34 = vadd.f32 %v567_v29, %v2555_v31  ;;  %v2061_v22 = vpop.f32.mrf.mxu1  ;;  %v918_v27 = vpack.c.bf16 %v873_v25, %v870_v24  ;;  %v886_v29 = vadd.f32 %v2568_v47, %v885_v20 }
 0x15f   : > { %v569_v33 = vpop.f32.mrf.mxu0  ;;  %v2232_v11 = vld [vmem:[#allocation2 + $0x30] ss:$8 sps:$4 sm:$0xff]  }
 0x160   : > { %701 = vst [vmem:[#allocation2 + $0x48] sm:$0xff] %v1963_v30  ;;  %v570_v35 = vadd.f32 %v569_v33, %v2557_v32  ;;  %v888_v23 = vpop.f32.mrf.mxu1  ;;  %v878_v33 = vadd.f32 %v2056_v13, %v2568_v47 }
 0x161   : > { %v571_v2 = vpop.f32.mrf.mxu0  ;;  %v889_v30 = vadd.f32 %v2568_v47, %v888_v23 }
 0x162   : > { %v1964_v36 = vpack.c.bf16 %v570_v35, %v568_v34  ;;  %v572_v38 = vadd.f32 %v571_v2, %v2555_v31  ;;  %v2064_v26 = vpop.f32.mrf.mxu1  ;;  %v881_v34 = vadd.f32 %v2057_v16, %v2568_v47 }
 0x163   : > { %v573_v37 = vpop.f32.mrf.mxu0  ;;  %v920_v2 = vpack.c.bf16 %v889_v30, %v886_v29 }
 0x164   : > { %702 = vst [vmem:[#allocation2 + $0x50] sm:$0xff] %v1964_v36  ;;  %v574_v39 = vadd.f32 %v573_v37, %v2557_v32  ;;  %v901_v28 = vpop.f32.mrf.mxu1  ;;  %v919_v36 = vpack.c.bf16 %v881_v34, %v878_v33 }
 0x165   : > { %v577_v40 = vpop.f32.mrf.mxu0 }
 0x166   : > { %v1965_v41 = vpack.c.bf16 %v574_v39, %v572_v38  ;;  %v578_v43 = vadd.f32 %v577_v40, %v2555_v31  ;;  %v2065_v35 = vpop.f32.mrf.mxu1  ;;  %v902_v38 = vadd.f32 %v2568_v47, %v901_v28 }
 0x167   : > { %v579_v42 = vpop.f32.mrf.mxu0  ;;  %v2229_v8 = vld [vmem:[#allocation2 + $0x40] ss:$8 sps:$4 sm:$0xff]  }
 0x168   : > { %703 = vst [vmem:[#allocation2 + $0x58] sm:$0xff] %v1965_v41  ;;  %v580_v44 = vadd.f32 %v579_v42, %v2557_v32  ;;  %v904_v37 = vpop.f32.mrf.mxu1  ;;  %v910_v41 = vadd.f32 %v2064_v26, %v2568_v47  ;;  %v913_v42 = vadd.f32 %v2065_v35, %v2568_v47 }
 0x169   : > { %v581_v45 = vpop.f32.mrf.mxu0  ;;  %v905_v53 = vadd.f32 %v2568_v47, %v904_v37 }
 0x16a   : > { %v1966_v46 = vpack.c.bf16 %v580_v44, %v578_v43  ;;  %v582_v49 = vadd.f32 %v581_v45, %v2555_v31  ;;  %v923_v43 = vpack.c.bf16 %v913_v42, %v910_v41 }
 0x16b   : > { %v583_v48 = vpop.f32.mrf.mxu0  ;;  %v922_v39 = vpack.c.bf16 %v905_v53, %v902_v38 }
 0x16c   : > { %704 = vst [vmem:[#allocation2 + $0x60] sm:$0xff] %v1966_v46  ;;  %v584_v50 = vadd.f32 %v583_v48, %v2557_v32 }
 0x16d   : > { %v587_v51 = vpop.f32.mrf.mxu0 }
 0x16e   : > { %v1967_v52 = vpack.c.bf16 %v584_v50, %v582_v49  ;;  %v588_v55 = vadd.f32 %v587_v51, %v2555_v31 }
 0x16f   : > { %v589_v54 = vpop.f32.mrf.mxu0  ;;  %v2225_v6 = vld [vmem:[#allocation2 + $0x54] ss:$8 sps:$4 sm:$0xff]   ;;  %v2226_v7 = vld [vmem:[#allocation2 + $0x50] ss:$8 sps:$4 sm:$0xff]  }
 0x170   : > { %705 = vst [vmem:[#allocation2 + $0x68] sm:$0xff] %v1967_v52  ;;  %v590_v56 = vadd.f32 %v589_v54, %v2557_v32 }
 0x171   : > { %v591_v57 = vpop.f32.mrf.mxu0 }
 0x172   : > { %v1968_v58 = vpack.c.bf16 %v590_v56, %v588_v55  ;;  %v592_v60 = vadd.f32 %v591_v57, %v2555_v31  ;;  %v2227_v31 = vld [vmem:[#allocation2 + $0x44] ss:$8 sps:$4 sm:$0xff]  }
 0x173   : > { %v593_v59 = vpop.f32.mrf.mxu0 }
 0x174   : > { %706 = vst [vmem:[#allocation2 + $0x70] sm:$0xff] %v1968_v58  ;;  %v594_v61 = vadd.f32 %v593_v59, %v2557_v32  ;;  %v2228_v32 = vld [vmem:[#allocation2 + $0x34] ss:$8 sps:$4 sm:$0xff]  }
 0x176   : > { %v1969_v63 = vpack.c.bf16 %v594_v61, %v592_v60 }
 0x177   : > { %v2223_v4 = vld [vmem:[#allocation2 + $0x60] ss:$8 sps:$4 sm:$0xff]   ;;  %v2224_v5 = vld [vmem:[#allocation2 + $0x64] ss:$8 sps:$4 sm:$0xff]  }
 0x178   : > { %707 = vst [vmem:[#allocation2 + $0x78] sm:$0xff] %v1969_v63 }
 0x17f   : > { %v2221_v0 = vld [vmem:[#allocation2 + $0x70] ss:$8 sps:$4 sm:$0xff]   ;;  %v2222_v1 = vld [vmem:[#allocation2 + $0x74] ss:$8 sps:$4 sm:$0xff]  }
 0x180   : > { %2066 = vmatprep.subr.bf16.mxu0 %v2221_v0  ;;  %2098 = vmatprep.subr.bf16.mxu1 %v2222_v1 }
 0x181   : > { %2067 = vmatpush3.bf16.xpose.msra.mxu0 %v2221_v0  ;;  %2099 = vmatpush3.bf16.msra.mxu1 %v2222_v1 }
 0x182   : > { %2068 = vmatprep.subr.bf16.mxu0 %v2223_v4  ;;  %2100 = vmatprep.subr.bf16.mxu1 %v2224_v5 }
 0x185   : > { %2101 = vmatpush3.bf16.msra.mxu1 %v2224_v5 }
 0x186   : > { %2102 = vmatprep.subr.bf16.mxu1 %v2225_v6 }
 0x189   : > { %2069 = vmatpush3.bf16.xpose.msra.mxu0 %v2223_v4  ;;  %2103 = vmatpush3.bf16.msra.mxu1 %v2225_v6 }
 0x18a   : > { %2070 = vmatprep.subr.bf16.mxu0 %v2226_v7  ;;  %2104 = vmatprep.subr.bf16.mxu1 %v2227_v31 }
 0x18d   : > { %2105 = vmatpush3.bf16.msra.mxu1 %v2227_v31 }
 0x18e   : > { %2106 = vmatprep.subr.bf16.mxu1 %v2228_v32 }
 0x191   : > { %2071 = vmatpush3.bf16.xpose.msra.mxu0 %v2226_v7  ;;  %2107 = vmatpush3.bf16.msra.mxu1 %v2228_v32 }
 0x192   : > { %2072 = vmatprep.subr.bf16.mxu0 %v2229_v8  ;;  %2108 = vmatprep.subr.bf16.mxu1 %v2230_v9 }
 0x195   : > { %2109 = vmatpush3.bf16.msra.mxu1 %v2230_v9 }
 0x196   : > { %2110 = vmatprep.subr.bf16.mxu1 %v2231_v10 }
 0x199   : > { %2073 = vmatpush3.bf16.xpose.msra.mxu0 %v2229_v8  ;;  %2111 = vmatpush3.bf16.msra.mxu1 %v2231_v10 }
 0x19a   : > { %2074 = vmatprep.subr.bf16.mxu0 %v2232_v11  ;;  %2112 = vmatprep.subr.bf16.mxu1 %v2233_v12 }
 0x19d   : > { %2113 = vmatpush3.bf16.msra.mxu1 %v2233_v12 }
 0x1a1   : > { %2075 = vmatpush3.bf16.xpose.msra.mxu0 %v2232_v11 }
 0x1a2   : > { %2076 = vmatprep.subr.bf16.mxu0 %v2234_v15 }
 0x1a9   : > { %2077 = vmatpush3.bf16.xpose.msra.mxu0 %v2234_v15 }
 0x1aa   : > { %2078 = vmatprep.subr.bf16.mxu0 %v2235_v18 }
 0x1b1   : > { %2079 = vmatpush3.bf16.xpose.msra.mxu0 %v2235_v18 }
 0x1b2   : > { %2080 = vmatprep.subr.bf16.mxu0 %v2236_v21 }
 0x1b9   : > { %2081 = vmatpush3.bf16.xpose.msra.mxu0 %v2236_v21 }
 0x1c0   : > { %2083 = vmatmul.mubr.bf16.vlgmr.msra.gmra.mxu0 %v917_v3  ;;  %v897_v3 = vadd.f32 %v2061_v22, %v2568_v47 }
 0x1c1   : > { %2086 = vmatprep.mubr.bf16.mxu0 %v918_v27 }
 0x1c2   : > { %v921_v40 = vpack.c.bf16 %v897_v3, %v894_v62 }
 0x1c8   : > { %2087 = vmatmul.mubr.bf16.gmra.mxu0 %v919_v36 }
 0x1c9   : > { %2090 = vmatprep.mubr.bf16.mxu0 %v920_v2 }
 0x1d0   : > { %2091 = vmatmul.mubr.bf16.gmra.mxu0 %v921_v40 }
 0x1d1   : > { %2094 = vmatprep.mubr.bf16.mxu0 %v922_v39 }
 0x1d8   : > { %2095 = vmatmul.mubr.bf16.gmra.mxu0 %v923_v43 }
 0x280   : > { %v2084_v44 = vpop.f32.mrf.mxu0 }
 0x282   : > { %v1041_v45 = vpop.f32.mrf.mxu0 }
 0x283   : > { %1104 = vmax.xlane.f32.xlu0 %v1041_v45 }
 0x284   : > { %v2085_v46 = vpop.f32.mrf.mxu0 }
 0x286   : > { %v1044_v48 = vpop.f32.mrf.mxu0 }
 0x287   : > { %1108 = vmax.xlane.f32.xlu0 %v2084_v44  ;;  %1106 = vmax.xlane.f32.xlu1 %v1044_v48 }
 0x288   : > { %v2088_v49 = vpop.f32.mrf.mxu0 }
 0x28a   : > { %v1057_v50 = vpop.f32.mrf.mxu0 }
 0x28b   : > { %1110 = vmax.xlane.f32.xlu1 %v2085_v46  ;;  %1112 = vmax.xlane.f32.xlu0 %v1057_v50 }
 0x28c   : > { %v2089_v51 = vpop.f32.mrf.mxu0 }
 0x28e   : > { %v1060_v52 = vpop.f32.mrf.mxu0 }
 0x28f   : > { %1116 = vmax.xlane.f32.xlu0 %v2088_v49  ;;  %1114 = vmax.xlane.f32.xlu1 %v1060_v52 }
 0x290   : > { %v2621_v54 = vpop.f32.mrf.mxu0 }
 0x292   : > { %v1073_v47 = vpop.f32.mrf.mxu0 }
 0x293   : > { %1118 = vmax.xlane.f32.xlu1 %v2089_v51  ;;  %1120 = vmax.xlane.f32.xlu0 %v1073_v47 }
 0x294   : > { %v2623_v55 = vpop.f32.mrf.mxu0 }
 0x296   : > { %v1076_v56 = vpop.f32.mrf.mxu0 }
 0x297   : > { %1124 = vmax.xlane.f32.xlu0 %v2621_v54  ;;  %1122 = vmax.xlane.f32.xlu1 %v1076_v56 }
 0x298   : > { %v2626_v57 = vpop.f32.mrf.mxu0 }
 0x29a   : > { %v2628_v58 = vpop.f32.mrf.mxu0 }
 0x29b   : > { %1126 = vmax.xlane.f32.xlu1 %v2623_v55  ;;  %1128 = vmax.xlane.f32.xlu0 %v2628_v58 }
 0x29c   : > { %v2632_v59 = vpop.f32.mrf.mxu0 }
 0x29e   : > { %v2634_v60 = vpop.f32.mrf.mxu0 }
 0x29f   : > { %1132 = vmax.xlane.f32.xlu0 %v2626_v57  ;;  %1130 = vmax.xlane.f32.xlu1 %v2634_v60 }
 0x2a3   : > { %1134 = vmax.xlane.f32.xlu1 %v2632_v59 }
 0x30c   : > { %v2639_v61 = vpop.xlane.xlu0 %1104 }
 0x30d   : > { %v1184_v63 = vsub.f32 %v1041_v45, %v2639_v61 }
 0x30f   : > { %v1200_v5 = vmul.f32 1.442695, %v1184_v63 }
 0x310   : > { %v2642_v0 = vpop.xlane.xlu0 %1108  ;;  %v2644_v1 = vpop.xlane.xlu1 %1106 }
 0x311   : > { %v1185_v4 = vsub.f32 %v1044_v48, %v2644_v1  ;;  %v1186_v6 = vsub.f32 %v2084_v44, %v2642_v0  ;;  %2245 = vpow2.f32 %v1200_v5 }
 0x313   : > { %v1202_v7 = vmul.f32 1.442695, %v1185_v4  ;;  %v1204_v9 = vmul.f32 1.442695, %v1186_v6 }
 0x314   : > { %v2648_v31 = vpop.xlane.xlu0 %1112  ;;  %v2650_v32 = vpop.xlane.xlu1 %1110 }
 0x315   : > { %v1187_v8 = vsub.f32 %v2085_v46, %v2650_v32  ;;  %v1188_v10 = vsub.f32 %v1057_v50, %v2648_v31  ;;  %2247 = vpow2.f32 %v1202_v7 }
 0x316   : > { %2249 = vpow2.f32 %v1204_v9 }
 0x317   : > { %v1206_v11 = vmul.f32 1.442695, %v1187_v8  ;;  %v1208_v15 = vmul.f32 1.442695, %v1188_v10 }
 0x318   : > { %v2654_v12 = vpop.xlane.xlu0 %1116  ;;  %v2656_v13 = vpop.xlane.xlu1 %1114 }
 0x319   : > { %v1189_v14 = vsub.f32 %v1060_v52, %v2656_v13  ;;  %v1190_v16 = vsub.f32 %v2088_v49, %v2654_v12  ;;  %2251 = vpow2.f32 %v1206_v11  ;;  %v1138_v11 = vsub.f32 -inf, %v2642_v0 }
 0x31a   : > { %2253 = vpow2.f32 %v1208_v15  ;;  %v1136_v15 = vsub.f32 -inf, %v2639_v61  ;;  %v1137_v0 = vsub.f32 -inf, %v2644_v1  ;;  %v1142_v61 = vsub.f32 -inf, %v2654_v12 }
 0x31b   : > { %v1210_v17 = vmul.f32 1.442695, %v1189_v14  ;;  %v1212_v21 = vmul.f32 1.442695, %v1190_v16  ;;  %v1156_v16 = vmul.f32 1.442695, %v1138_v11 }
 0x31c   : > { %v2660_v18 = vpop.xlane.xlu0 %1120  ;;  %v2662_v19 = vpop.xlane.xlu1 %1118 }
 0x31d   : > { %v1191_v20 = vsub.f32 %v2089_v51, %v2662_v19  ;;  %v1192_v22 = vsub.f32 %v1073_v47, %v2660_v18  ;;  %2255 = vpow2.f32 %v1210_v17  ;;  %v2237_v17 = vld [vmem:[%s2908_s4] sm:$0xff]  }
 0x31e   : > { %2257 = vpow2.f32 %v1212_v21  ;;  %v2673_v29 = vpop.eup %2245 }
 0x31f   : > { %v1214_v23 = vmul.f32 1.442695, %v1191_v20  ;;  %v1216_v27 = vmul.f32 1.442695, %v1192_v22  ;;  %v1139_v20 = vsub.f32 -inf, %v2650_v32  ;;  %v1140_v32 = vsub.f32 -inf, %v2648_v31 }
 0x320   : > { %v2666_v24 = vpop.xlane.xlu0 %1124  ;;  %v2668_v25 = vpop.xlane.xlu1 %1122 }
 0x321   : > { %v1193_v26 = vsub.f32 %v1076_v56, %v2668_v25  ;;  %v1194_v28 = vsub.f32 %v2621_v54, %v2666_v24  ;;  %2259 = vpow2.f32 %v1214_v23  ;;  %v1152_v23 = vmul.f32 1.442695, %v1136_v15 }
 0x322   : > { %v2679_v35 = vpop.eup %2247  ;;  %2261 = vpow2.f32 %v1216_v27 }
 0x323   : > { %v1218_v30 = vmul.f32 1.442695, %v1193_v26  ;;  %v1296_v36 = vpack.c.bf16 %v2679_v35, %v2673_v29  ;;  %v1220_v37 = vmul.f32 1.442695, %v1194_v28  ;;  %v2250_v53 = vpop.eup %2249  ;;  %v1158_v26 = vmul.f32 1.442695, %v1139_v20 }
 0x324   : > { %v2675_v33 = vpop.xlane.xlu0 %1128  ;;  %v2677_v34 = vpop.xlane.xlu1 %1126 }
 0x325   : > { %v1195_v2 = vsub.f32 %v2623_v55, %v2677_v34  ;;  %v1196_v38 = vsub.f32 %v2628_v58, %v2675_v33  ;;  %2263 = vpow2.f32 %v1218_v30  ;;  %2114 = vmatprep.mubr.bf16.mxu1 %v1296_v36  ;;  %v1154_v30 = vmul.f32 1.442695, %v1137_v0 }
 0x326   : > { %v2252_v40 = vpop.eup %2251  ;;  %2265 = vpow2.f32 %v1220_v37  ;;  %v1164_v36 = vmul.f32 1.442695, %v1142_v61 }
 0x327   : > { %v1222_v62 = vmul.f32 1.442695, %v1195_v2  ;;  %v1297_v43 = vpack.c.bf16 %v2252_v40, %v2250_v53  ;;  %v1224_v44 = vmul.f32 1.442695, %v1196_v38  ;;  %v2254_v46 = vpop.eup %2253  ;;  %v1160_v38 = vmul.f32 1.442695, %v1140_v32 }
 0x328   : > { %v2687_v3 = vpop.xlane.xlu0 %1132  ;;  %v2689_v39 = vpop.xlane.xlu1 %1130  ;;  %v1525_v32 = vld [vmem:[%s2909_s5 + $0x20] sm:$0xff] }
 0x329   : > { %v1198_v41 = vsub.f32 %v2626_v57, %v2687_v3  ;;  %v1197_v42 = vsub.f32 %v2634_v60, %v2689_v39  ;;  %2267 = vpow2.f32 %v1222_v62  ;;  %2115 = vmatmul.mubr.bf16.vlgmr.msra.gmra.mxu1 %v1297_v43 }
 0x32a   : > { %v2256_v50 = vpop.eup %2255 }
 0x32b   : > { %v1228_v45 = vmul.f32 1.442695, %v1198_v41  ;;  %v1226_v48 = vmul.f32 1.442695, %v1197_v42  ;;  %v1298_v52 = vpack.c.bf16 %v2256_v50, %v2254_v46  ;;  %v2258_v47 = vpop.eup %2257  ;;  %v1145_v42 = vsub.f32 -inf, %v2668_v25 }
 0x32c   : > { %v2695_v49 = vpop.xlane.xlu1 %1134 }
 0x32d   : > { %v1199_v51 = vsub.f32 %v2632_v59, %v2695_v49  ;;  %2269 = vpow2.f32 %v1228_v45  ;;  %2118 = vmatprep.mubr.bf16.mxu1 %v1298_v52 }
 0x32e   : > { %2271 = vpow2.f32 %v1224_v44  ;;  %v2260_v55 = vpop.eup %2259 }
 0x32f   : > { %v1230_v54 = vmul.f32 1.442695, %v1199_v51  ;;  %2273 = vpow2.f32 %v1226_v48  ;;  %v1299_v56 = vpack.c.bf16 %v2260_v55, %v2258_v47  ;;  %v2262_v57 = vpop.eup %2261 }
 0x331   : > { %2275 = vpow2.f32 %v1230_v54  ;;  %2119 = vmatmul.mubr.bf16.gmra.mxu1 %v1299_v56  ;;  %v1149_v56 = vsub.f32 -inf, %v2689_v39 }
 0x332   : > { %v2264_v58 = vpop.eup %2263  ;;  %2277 = vpow2.f32 %v1156_v16 }
 0x333   : > { %v1300_v60 = vpack.c.bf16 %v2264_v58, %v2262_v57  ;;  %v2266_v63 = vpop.eup %2265  ;;  %2279 = vpow2.f32 %v1152_v23  ;;  %v1524_v23 = vld [vmem:[%s2909_s5 + $0x18] sm:$0xff] }
 0x334   : > { %2281 = vpow2.f32 %v1158_v26 }
 0x335   : > { %2122 = vmatprep.mubr.bf16.mxu1 %v1300_v60  ;;  %2283 = vpow2.f32 %v1154_v30 }
 0x336   : > { %v2268_v4 = vpop.eup %2267  ;;  %2285 = vpow2.f32 %v1164_v36  ;;  %v1521_v36 = vld [vmem:[%s2909_s5] sm:$0xff] }
 0x337   : > { %v1301_v5 = vpack.c.bf16 %v2268_v4, %v2266_v63 }
 0x339   : > { %2123 = vmatmul.mubr.bf16.gmra.mxu1 %v1301_v5 }
 0x33a   : > { %v2270_v6 = vpop.eup %2269 }
 0x33b   : > { %v2272_v59 = vpop.eup %2271  ;;  %1276 = vadd.xlane.f32.xlu0 %v2270_v6 }
 0x33c   : > { %v2274_v7 = vpop.eup %2273 }
 0x33d   : > { %v1302_v8 = vpack.c.bf16 %v2274_v7, %v2272_v59 }
 0x33e   : > { %v2276_v9 = vpop.eup %2275 }
 0x33f   : > { %2126 = vmatprep.mubr.bf16.mxu1 %v1302_v8  ;;  %1272 = vadd.xlane.f32.xlu0 %v2272_v59  ;;  %v1303_v10 = vpack.c.bf16 %v2276_v9, %v2270_v6  ;;  %v1178_v8 = vmul.f32 1.442695, %v1149_v56 }
 0x340   : > { %1278 = vadd.xlane.f32.xlu1 %v2276_v9 }
 0x341   : > { %2127 = vmatmul.mubr.bf16.gmra.mxu1 %v1303_v10 }
 0x342   : > { %2146 = vmatprep.mubr.bf16.mxu1 %v2237_v17 }
 0x343   : > { %1268 = vadd.xlane.f32.xlu0 %v2266_v63 }
 0x344   : > { %1274 = vadd.xlane.f32.xlu1 %v2274_v7 }
 0x347   : > { %1264 = vadd.xlane.f32.xlu0 %v2262_v57 }
 0x348   : > { %1270 = vadd.xlane.f32.xlu1 %v2268_v4 }
 0x34b   : > { %1260 = vadd.xlane.f32.xlu0 %v2258_v47 }
 0x34c   : > { %1266 = vadd.xlane.f32.xlu1 %v2264_v58 }
 0x34f   : > { %1256 = vadd.xlane.f32.xlu0 %v2254_v46 }
 0x350   : > { %1262 = vadd.xlane.f32.xlu1 %v2260_v55  ;;  %v1151_v55 = vsub.f32 -inf, %v2695_v49 }
 0x352   : > { %v1182_v59 = vmul.f32 1.442695, %v1151_v55 }
 0x353   : > { %1252 = vadd.xlane.f32.xlu0 %v2250_v53  ;;  %v1144_v53 = vsub.f32 -inf, %v2660_v18  ;;  %v1148_v18 = vsub.f32 -inf, %v2675_v33  ;;  %v1522_v33 = vld [vmem:[%s2909_s5 + $0x8] sm:$0xff] }
 0x354   : > { %1258 = vadd.xlane.f32.xlu1 %v2256_v50  ;;  %v1170_v50 = vmul.f32 1.442695, %v1145_v42 }
 0x355   : > { %v1168_v41 = vmul.f32 1.442695, %v1144_v53  ;;  %v1176_v25 = vmul.f32 1.442695, %v1148_v18 }
 0x357   : > { %1248 = vadd.xlane.f32.xlu0 %v2673_v29  ;;  %v1143_v29 = vsub.f32 -inf, %v2662_v19  ;;  %v1146_v19 = vsub.f32 -inf, %v2666_v24 }
 0x358   : > { %1254 = vadd.xlane.f32.xlu1 %v2252_v40  ;;  %v2278_v40 = vpop.eup %2277 }
 0x359   : > { %v1166_v37 = vmul.f32 1.442695, %v1143_v29  ;;  %v1172_v44 = vmul.f32 1.442695, %v1146_v19  ;;  %v2733_v48 = vmul.f32 0.0, %v2278_v40  ;;  %v2280_v24 = vpop.eup %2279  ;;  %v1526_v40 = vld [vmem:[%s2909_s5 + $0x28] sm:$0xff] }
 0x35a   : > { %v2282_v52 = vpop.eup %2281  ;;  %v1232_v57 = vmul.f32 0.0, %v2280_v24 }
 0x35b   : > { %2287 = vpow2.f32 %v1166_v37  ;;  %v2742_v60 = vmul.f32 0.0, %v2282_v52  ;;  %v2284_v63 = vpop.eup %2283 }
 0x35c   : > { %1250 = vadd.xlane.f32.xlu1 %v2679_v35  ;;  %v1141_v35 = vsub.f32 -inf, %v2656_v13  ;;  %v1147_v13 = vsub.f32 -inf, %v2677_v34  ;;  %2289 = vpow2.f32 %v1160_v38  ;;  %v1150_v34 = vsub.f32 -inf, %v2687_v3  ;;  %v1523_v3 = vld [vmem:[%s2909_s5 + $0x10] sm:$0xff]  ;;  %v2286_v6 = vpop.eup %2285 }
 0x35d   : > { %v1233_v10 = vmul.f32 0.0, %v2284_v63  ;;  %v2748_v15 = vmul.f32 0.0, %v2286_v6 }
 0x35e   : > { %v1162_v12 = vmul.f32 1.442695, %v1141_v35  ;;  %v1174_v46 = vmul.f32 1.442695, %v1147_v13  ;;  %v1180_v4 = vmul.f32 1.442695, %v1150_v34 }
 0x360   : > { %2291 = vpow2.f32 %v1162_v12 }
 0x361   : > { %2293 = vpow2.f32 %v1168_v41 }
 0x362   : > { %2295 = vpow2.f32 %v1172_v44 }
 0x363   : > { %2297 = vpow2.f32 %v1174_v46 }
 0x368   : > { %v2288_v7 = vpop.eup %2287 }
 0x369   : > { %v2290_v9 = vpop.eup %2289  ;;  %v2750_v17 = vmul.f32 0.0, %v2288_v7 }
 0x36a   : > { %v2756_v26 = vmul.f32 0.0, %v2290_v9 }
 0x36d   : > { %1544 = vperm.xlu1 %2188, %v1522_v33   ;;  %v2292_v11 = vpop.eup %2291  ;;  %1539 = vperm.xlu0 %2187, %v1521_v36  }
 0x36e   : > { %v2759_v29 = vmul.f32 0.0, %v2292_v11  ;;  %v2294_v30 = vpop.eup %2293 }
 0x36f   : > { %v2296_v37 = vpop.eup %2295 }
 0x370   : > { %v2298_v12 = vpop.eup %2297  ;;  %v2776_v42 = vmul.f32 0.0, %v2296_v37 }
 0x371   : > { %1549 = vperm.xlu1 %2188, %v1523_v3   ;;  %v2778_v44 = vmul.f32 0.0, %v2298_v12 }
 0x375   : > { %1554 = vperm.xlu1 %2188, %v1524_v23  }
 0x379   : > { %1559 = vperm.xlu1 %2188, %v1525_v32  }
 0x37d   : > { %1564 = vperm.xlu1 %2188, %v1526_v40  }
 0x3c4   : > { %v2702_v14 = vpop.xlane.xlu0 %1276 }
 0x3c8   : > { %v2709_v21 = vpop.xlane.xlu0 %1272 }
 0x3c9   : > { %v2711_v22 = vpop.xlane.xlu1 %1278 }
 0x3cc   : > { %v2714_v27 = vpop.xlane.xlu0 %1268 }
 0x3cd   : > { %v2717_v28 = vpop.xlane.xlu1 %1274  ;;  %v1290_v24 = vadd.f32 %v2714_v27, %v2776_v42  ;;  %v1527_v27 = vld [vmem:[%s2909_s5 + $0x30] sm:$0xff] }
 0x3ce   : > { %1569 = vperm.xlu1 %2188, %v1527_v27  }
 0x3d0   : > { %v2722_v2 = vpop.xlane.xlu0 %1264 }
 0x3d1   : > { %v2724_v1 = vpop.xlane.xlu1 %1270 }
 0x3d2   : > { %v1291_v34 = vadd.f32 %v2724_v1, %v2778_v44 }
 0x3d4   : > { %v1261_v62 = vpop.xlane.xlu0 %1260 }
 0x3d5   : > { %v2728_v31 = vpop.xlane.xlu1 %1266  ;;  %v1286_v0 = vadd.f32 %v1261_v62, %v2748_v15  ;;  %v1530_v62 = vld [vmem:[%s2909_s5 + $0x48] sm:$0xff] }
 0x3d6   : > { %1584 = vperm.xlu0 %2187, %v1530_v62  }
 0x3d8   : > { %v1257_v43 = vpop.xlane.xlu0 %1256 }
 0x3d9   : > { %v1263_v45 = vpop.xlane.xlu1 %1262  ;;  %v1284_v35 = vadd.f32 %v1257_v43, %v2756_v26 }
 0x3da   : > { %v1287_v61 = vadd.f32 %v1263_v45, %v2750_v17 }
 0x3dc   : > { %v1253_v51 = vpop.xlane.xlu0 %1252 }
 0x3dd   : > { %v1282_v54 = vadd.f32 %v1253_v51, %v2733_v48  ;;  %v1259_v47 = vpop.xlane.xlu1 %1258  ;;  %v1532_v51 = vld [vmem:[%s2909_s5 + $0x58] sm:$0xff] }
 0x3de   : > { %v1285_v38 = vadd.f32 %v1259_v47, %v2759_v29  ;;  %1594 = vperm.xlu0 %2187, %v1532_v51  }
 0x3df   : > { %2299 = vrcp.f32 %v1282_v54 }
 0x3e0   : > { %2301 = vpow2.f32 %v1170_v50  ;;  %v1249_v58 = vpop.xlane.xlu0 %1248 }
 0x3e1   : > { %v1280_v49 = vadd.f32 %v1249_v58, %v1232_v57  ;;  %v1255_v5 = vpop.xlane.xlu1 %1254  ;;  %2303 = vpow2.f32 %v1176_v25 }
 0x3e2   : > { %v1283_v39 = vadd.f32 %v1255_v5, %v2742_v60  ;;  %v1528_v5 = vld [vmem:[%s2909_s5 + $0x38] sm:$0xff] }
 0x3e3   : > { %2305 = vrcp.f32 %v1280_v49  ;;  %1574 = vperm.xlu1 %2188, %v1528_v5  }
 0x3e4   : > { %2307 = vrcp.f32 %v1283_v39 }
 0x3e5   : > { %2309 = vpow2.f32 %v1180_v4  ;;  %v1251_v16 = vpop.xlane.xlu1 %1250  ;;  %v1534_v4 = vld [vmem:[%s2909_s5 + $0x68] sm:$0xff] }
 0x3e6   : > { %2311 = vpow2.f32 %v1182_v59  ;;  %v1281_v20 = vadd.f32 %v1251_v16, %v1233_v10  ;;  %1604 = vperm.xlu0 %2187, %v1534_v4  }
 0x3e7   : > { %2313 = vpow2.f32 %v1178_v8 }
 0x3e8   : > { %2315 = vrcp.f32 %v1281_v20  ;;  %v1536_v20 = vld [vmem:[%s2909_s5 + $0x78] sm:$0xff] }
 0x3e9   : > { %2317 = vrcp.f32 %v1286_v0  ;;  %v2116_v53 = vpop.f32.mrf.mxu1 }
 0x3ea   : > { %2319 = vrcp.f32 %v1287_v61  ;;  %v1451_v13 = vadd.f32 %v2116_v53, %v2733_v48  ;;  %v2782_v48 = vmul.f32 0.0, %v2294_v30  ;;  %1614 = vperm.xlu0 %2187, %v1536_v20   ;;  %v2243_v20 = vld [vmem:[%s2908_s4 + $0x30] sm:$0xff]  }
 0x3eb   : > { %2321 = vrcp.f32 %v1284_v35  ;;  %v1386_v43 = vpop.f32.mrf.mxu1 }
 0x3ec   : > { %v2300_v19 = vpop.eup %2299  ;;  %2323 = vrcp.f32 %v1285_v38  ;;  %v1449_v18 = vadd.f32 %v1386_v43, %v1232_v57  ;;  %v1288_v55 = vadd.f32 %v2722_v2, %v2782_v48 }
 0x3ed   : > { %v2302_v41 = vpop.eup %2301  ;;  %v1470_v45 = vmul.f32 %v2300_v19, %v1451_v13  ;;  %v2117_v50 = vpop.f32.mrf.mxu1  ;;  %2325 = vrcp.f32 %v1290_v24 }
 0x3ee   : > { %v2304_v46 = vpop.eup %2303  ;;  %v2789_v54 = vmul.f32 0.0, %v2302_v41  ;;  %v1452_v47 = vadd.f32 %v2117_v50, %v2742_v60  ;;  %2327 = vrcp.f32 %v1291_v34 }
 0x3ef   : > { %v1389_v56 = vpop.f32.mrf.mxu1  ;;  %2329 = vrcp.f32 %v1288_v55 }
 0x3f0   : > { %v2306_v52 = vpop.eup %2305  ;;  %v1289_v58 = vadd.f32 %v2728_v31, %v2789_v54  ;;  %v1450_v1 = vadd.f32 %v1389_v56, %v1233_v10  ;;  %v1244_v10 = vmul.f32 0.0, %v2304_v46  ;;  %v1533_v46 = vld [vmem:[%s2909_s5 + $0x60] sm:$0xff] }
 0x3f1   : > { %v2308_v25 = vpop.eup %2307  ;;  %v1466_v33 = vmul.f32 %v2306_v52, %v1449_v18  ;;  %v2120_v60 = vpop.f32.mrf.mxu1 }
 0x3f2   : > { %v2310_v57 = vpop.eup %2309  ;;  %v1472_v3 = vmul.f32 %v2308_v25, %v1452_v47  ;;  %2331 = vrcp.f32 %v1289_v58  ;;  %v1455_v8 = vadd.f32 %v2120_v60, %v2748_v15  ;;  %v1292_v35 = vadd.f32 %v2709_v21, %v1244_v10  ;;  %v1531_v21 = vld [vmem:[%s2909_s5 + $0x50] sm:$0xff] }
 0x3f3   : > { %v2312_v63 = vpop.eup %2311  ;;  %v2807_v6 = vmul.f32 0.0, %v2310_v57  ;;  %v1402_v59 = vpop.f32.mrf.mxu1 }
 0x3f4   : > { %v2314_v49 = vpop.eup %2313  ;;  %v2802_v2 = vpack.c.bf16 %v1472_v3, %v1470_v45  ;;  %v2809_v39 = vmul.f32 0.0, %v2312_v63  ;;  %v1453_v61 = vadd.f32 %v1402_v59, %v2756_v26 }
 0x3f5   : > { %v2316_v31 = vpop.eup %2315  ;;  %v1294_v9 = vadd.f32 %v2702_v14, %v2807_v6  ;;  %v2814_v11 = vmul.f32 0.0, %v2314_v49  ;;  %v2121_v16 = vpop.f32.mrf.mxu1  ;;  %v1529_v14 = vld [vmem:[%s2909_s5 + $0x40] sm:$0xff] }
 0x3f6   : > { %v1468_v7 = vmul.f32 %v2316_v31, %v1450_v1  ;;  %v2318_v23 = vpop.eup %2317  ;;  %v1295_v0 = vadd.f32 %v2711_v22, %v2809_v39  ;;  %v1456_v15 = vadd.f32 %v2121_v16, %v2750_v17  ;;  %1579 = vperm.xlu1 %2188, %v1529_v14   ;;  %v2242_v16 = vld [vmem:[%s2908_s4 + $0x28] sm:$0xff]  }
 0x3f7   : > { %v2320_v30 = vpop.eup %2319  ;;  %v1405_v36 = vpop.f32.mrf.mxu1  ;;  %v1293_v38 = vadd.f32 %v2717_v28, %v2814_v11  ;;  %v1478_v12 = vmul.f32 %v2318_v23, %v1455_v8  ;;  %2333 = vrcp.f32 %v1294_v9  ;;  %v2244_v23 = vld [vmem:[%s2908_s4 + $0x38] sm:$0xff]  }
 0x3f8   : > { %v2823_v32 = vpack.c.bf16 %v1468_v7, %v1466_v33  ;;  %v2322_v37 = vpop.eup %2321  ;;  %v1480_v22 = vmul.f32 %v2320_v30, %v1456_v15  ;;  %v1454_v26 = vadd.f32 %v1405_v36, %v2759_v29  ;;  %2335 = vrcp.f32 %v1295_v0  ;;  %v1545_v0 = vpop.permute.xlu1 %1544 }
 0x3f9   : > { %v2324_v17 = vpop.eup %2323  ;;  %v2124_v53 = vpop.f32.mrf.mxu1  ;;  %v1474_v62 = vmul.f32 %v2322_v37, %v1453_v61  ;;  %2337 = vrcp.f32 %v1292_v35 }
 0x3fa   : > { %v1476_v19 = vmul.f32 %v2324_v17, %v1454_v26  ;;  %v1500_v13 = vpack.c.bf16 %v1480_v22, %v1478_v12  ;;  %2339 = vrcp.f32 %v1293_v38  ;;  %v1459_v28 = vadd.f32 %v2124_v53, %v2776_v42  ;;  %1589 = vperm.xlu1 %2188, %v1531_v21   ;;  %v2326_v43 = vpop.eup %2325  ;;  %v1540_v38 = vpop.permute.xlu0 %1539 }
 0x3fb   : > { %v1418_v40 = vpop.f32.mrf.mxu1  ;;  %v2328_v24 = vpop.eup %2327 }
 0x3fc   : > { %v1499_v41 = vpack.c.bf16 %v1476_v19, %v1474_v62  ;;  %v1457_v45 = vadd.f32 %v1418_v40, %v2782_v48  ;;  %v2330_v51 = vpop.eup %2329  ;;  %v1486_v52 = vmul.f32 %v2326_v43, %v1459_v28  ;;  %v1550_v61 = vpop.permute.xlu1 %1549 }
 0x3fd   : > { %v2125_v29 = vpop.f32.mrf.mxu1 }
 0x3fe   : > { %v1460_v18 = vadd.f32 %v2125_v29, %v2778_v44  ;;  %1599 = vperm.xlu1 %2188, %v1533_v46   ;;  %v1482_v25 = vmul.f32 %v2330_v51, %v1457_v45  ;;  %v1535_v44 = vld [vmem:[%s2909_s5 + $0x70] sm:$0xff] }
 0x3ff   : > { %v1421_v50 = vpop.f32.mrf.mxu1  ;;  %v2332_v42 = vpop.eup %2331 }
 0x400   : > { %v1488_v34 = vmul.f32 %v2328_v24, %v1460_v18  ;;  %v1458_v47 = vadd.f32 %v1421_v50, %v2789_v54  ;;  %v1555_v15 = vpop.permute.xlu1 %1554 }
 0x401   : > { %v2128_v27 = vpop.f32.mrf.mxu1 }
 0x402   : > { %v1484_v55 = vmul.f32 %v2332_v42, %v1458_v47  ;;  %v1502_v33 = vpack.c.bf16 %v1488_v34, %v1486_v52  ;;  %v1463_v56 = vadd.f32 %v2128_v27, %v2807_v6  ;;  %1609 = vperm.xlu1 %2188, %v1535_v44  }
 0x403   : > { %v1434_v48 = vpop.f32.mrf.mxu1 }
 0x404   : > { %v1501_v57 = vpack.c.bf16 %v1484_v55, %v1482_v25  ;;  %v2334_v3 = vpop.eup %2333  ;;  %v1461_v1 = vadd.f32 %v1434_v48, %v1244_v10  ;;  %v2239_v10 = vld [vmem:[%s2908_s4 + $0x10] sm:$0xff]  }
 0x405   : > { %v2129_v58 = vpop.f32.mrf.mxu1  ;;  %v2336_v63 = vpop.eup %2335  ;;  %v1494_v49 = vmul.f32 %v2334_v3, %v1463_v56 }
 0x406   : > { %v1464_v54 = vadd.f32 %v2129_v58, %v2809_v39  ;;  %v2338_v4 = vpop.eup %2337  ;;  %v2238_v39 = vld [vmem:[%s2908_s4 + $0x8] sm:$0xff]  }
 0x407   : > { %v1437_v60 = vpop.f32.mrf.mxu1  ;;  %v2340_v59 = vpop.eup %2339  ;;  %v1490_v7 = vmul.f32 %v2338_v4, %v1461_v1 }
 0x408   : > { %v1496_v5 = vmul.f32 %v2336_v63, %v1464_v54  ;;  %v1462_v31 = vadd.f32 %v1437_v60, %v2814_v11  ;;  %v2240_v11 = vld [vmem:[%s2908_s4 + $0x18] sm:$0xff]  }
 0x40a   : > { %v1492_v8 = vmul.f32 %v2340_v59, %v1462_v31  ;;  %v1504_v9 = vpack.c.bf16 %v1496_v5, %v1494_v49 }
 0x40c   : > { %2130 = vmatprep.subr.bf16.mxu1 %v1504_v9  ;;  %v1503_v6 = vpack.c.bf16 %v1492_v8, %v1490_v7 }
 0x40d   : > { %2131 = vmatpush3.bf16.xpose.msra.mxu1 %v1504_v9 }
 0x40e   : > { %2132 = vmatprep.subr.bf16.mxu1 %v1503_v6 }
 0x415   : > { %2133 = vmatpush3.bf16.xpose.msra.mxu1 %v1503_v6 }
 0x416   : > { %2134 = vmatprep.subr.bf16.mxu1 %v1502_v33 }
 0x41d   : > { %2135 = vmatpush3.bf16.xpose.msra.mxu1 %v1502_v33 }
 0x41e   : > { %2136 = vmatprep.subr.bf16.mxu1 %v1501_v57 }
 0x425   : > { %2137 = vmatpush3.bf16.xpose.msra.mxu1 %v1501_v57 }
 0x426   : > { %2138 = vmatprep.subr.bf16.mxu1 %v1500_v13 }
 0x42d   : > { %2139 = vmatpush3.bf16.xpose.msra.mxu1 %v1500_v13 }
 0x42e   : > { %2140 = vmatprep.subr.bf16.mxu1 %v1499_v41 }
 0x435   : > { %2141 = vmatpush3.bf16.xpose.msra.mxu1 %v1499_v41 }
 0x436   : > { %2142 = vmatprep.subr.bf16.mxu1 %v2802_v2 }
 0x43d   : > { %2143 = vmatpush3.bf16.xpose.msra.mxu1 %v2802_v2  ;;  %v2241_v2 = vld [vmem:[%s2908_s4 + $0x20] sm:$0xff]  }
 0x43e   : > { %2144 = vmatprep.subr.bf16.mxu1 %v2823_v32 }
 0x445   : > { %2145 = vmatpush3.bf16.xpose.msra.mxu1 %v2823_v32  ;;  %v1560_v32 = vpop.permute.xlu1 %1559 }
 0x449   : > { %v1565_v14 = vpop.permute.xlu1 %1564 }
 0x44c   : > { %2147 = vmatmul.mubr.bf16.vlgmr.msra.gmra.mxu1 %v2238_v39 }
 0x44d   : > { %2150 = vmatprep.mubr.bf16.mxu1 %v2239_v10  ;;  %v1570_v30 = vpop.permute.xlu1 %1569 }
 0x451   : > { %v1585_v40 = vpop.permute.xlu0 %1584 }
 0x454   : > { %2151 = vmatmul.mubr.bf16.gmra.mxu1 %v2240_v11 }
 0x455   : > { %2154 = vmatprep.mubr.bf16.mxu1 %v2241_v2 }
 0x459   : > { %v1595_v24 = vpop.permute.xlu0 %1594 }
 0x45c   : > { %2155 = vmatmul.mubr.bf16.gmra.mxu1 %v2242_v16 }
 0x45d   : > { %2158 = vmatprep.mubr.bf16.mxu1 %v2243_v20 }
 0x45e   : > { %v1575_v35 = vpop.permute.xlu1 %1574 }
 0x461   : > { %v1605_v25 = vpop.permute.xlu0 %1604 }
 0x464   : > { %2159 = vmatmul.mubr.bf16.gmra.mxu1 %v2244_v23 }
 0x465   : > { %v1615_v3 = vpop.permute.xlu0 %1614 }
 0x471   : > { %v1580_v53 = vpop.permute.xlu1 %1579 }
 0x475   : > { %v1590_v29 = vpop.permute.xlu1 %1589 }
 0x479   : > { %v1600_v52 = vpop.permute.xlu1 %1599 }
 0x47d   : > { %v1610_v44 = vpop.permute.xlu1 %1609 }
 0x50c   : > { %v2148_v36 = vpop.f32.mrf.mxu1 }
 0x50d   : > { %v1708_v37 = vadd.f32 %v2148_v36, %v1550_v61 }
 0x50e   : > { %v1699_v12 = vpop.f32.mrf.mxu1 }
 0x50f   : > { %1764 = vst [vmem:[%s2877_s13 + $0x10] sm:$0xff] %v1708_v37  ;;  %v1700_v22 = vadd.f32 %v1699_v12, %v1540_v38 }
 0x510   : > { %v2149_v26 = vpop.f32.mrf.mxu1 }
 0x511   : > { %1762 = vst [vmem:[%s2877_s13] sm:$0xff] %v1700_v22  ;;  %v1711_v17 = vadd.f32 %v2149_v26, %v1555_v15 }
 0x512   : > { %v1702_v62 = vpop.f32.mrf.mxu1 }
 0x513   : > { %1765 = vst [vmem:[%s2877_s13 + $0x18] sm:$0xff] %v1711_v17  ;;  %v1703_v19 = vadd.f32 %v1702_v62, %v1545_v0 }
 0x514   : > { %v2152_v13 = vpop.f32.mrf.mxu1 }
 0x515   : > { %1763 = vst [vmem:[%s2877_s13 + $0x8] sm:$0xff] %v1703_v19  ;;  %v1724_v21 = vadd.f32 %v2152_v13, %v1570_v30 }
 0x516   : > { %v1715_v28 = vpop.f32.mrf.mxu1 }
 0x517   : > { %1768 = vst [vmem:[%s2877_s13 + $0x30] sm:$0xff] %v1724_v21  ;;  %v1716_v41 = vadd.f32 %v1715_v28, %v1560_v32 }
 0x518   : > { %v2153_v43 = vpop.f32.mrf.mxu1 }
 0x519   : > { %1766 = vst [vmem:[%s2877_s13 + $0x20] sm:$0xff] %v1716_v41  ;;  %v1727_v45 = vadd.f32 %v2153_v43, %v1575_v35 }
 0x51a   : > { %v1718_v18 = vpop.f32.mrf.mxu1 }
 0x51b   : > { %1769 = vst [vmem:[%s2877_s13 + $0x38] sm:$0xff] %v1727_v45  ;;  %v1719_v46 = vadd.f32 %v1718_v18, %v1565_v14 }
 0x51c   : > { %v2156_v50 = vpop.f32.mrf.mxu1 }
 0x51d   : > { %1767 = vst [vmem:[%s2877_s13 + $0x28] sm:$0xff] %v1719_v46  ;;  %v1740_v51 = vadd.f32 %v2156_v50, %v1590_v29 }
 0x51e   : > { %v1731_v34 = vpop.f32.mrf.mxu1 }
 0x51f   : > { %1772 = vst [vmem:[%s2877_s13 + $0x50] sm:$0xff] %v1740_v51  ;;  %v1732_v47 = vadd.f32 %v1731_v34, %v1580_v53 }
 0x520   : > { %v2157_v42 = vpop.f32.mrf.mxu1 }
 0x521   : > { %1770 = vst [vmem:[%s2877_s13 + $0x40] sm:$0xff] %v1732_v47  ;;  %v1743_v27 = vadd.f32 %v2157_v42, %v1595_v24 }
 0x522   : > { %v1734_v55 = vpop.f32.mrf.mxu1 }
 0x523   : > { %1773 = vst [vmem:[%s2877_s13 + $0x58] sm:$0xff] %v1743_v27  ;;  %v1735_v33 = vadd.f32 %v1734_v55, %v1585_v40 }
 0x524   : > { %v2160_v48 = vpop.f32.mrf.mxu1 }
 0x525   : > { %1771 = vst [vmem:[%s2877_s13 + $0x48] sm:$0xff] %v1735_v33  ;;  %v1756_v56 = vadd.f32 %v2160_v48, %v1610_v44 }
 0x526   : > { %v1747_v57 = vpop.f32.mrf.mxu1 }
 0x527   : > { %1776 = vst [vmem:[%s2877_s13 + $0x70] sm:$0xff] %v1756_v56  ;;  %v1748_v58 = vadd.f32 %v1747_v57, %v1600_v52 }
 0x528   : > { %v2161_v1 = vpop.f32.mrf.mxu1 }
 0x529   : > { %1774 = vst [vmem:[%s2877_s13 + $0x60] sm:$0xff] %v1748_v58  ;;  %v1759_v54 = vadd.f32 %v2161_v1, %v1615_v3 }
 0x52a   : > { %v1750_v63 = vpop.f32.mrf.mxu1 }
 0x52b   : > { %1777 = vst [vmem:[%s2877_s13 + $0x78] sm:$0xff] %v1759_v54  ;;  %v1751_v60 = vadd.f32 %v1750_v63, %v1605_v25 }
 0x52d   : > { %1775 = vst [vmem:[%s2877_s13 + $0x68] sm:$0xff] %v1751_v60 }
 0x52e PF: > { %s17_s26 = sadd.s32 1, %s2363_s26   ;;  %s2912_s24 = smov %s2359_s25 }
 0x52f   : > { %p14_p5 = scmp.ge.s32.totalorder %s17_s26, 4   ;;  %s2913_s25 = smov %s2915_s6 }
 0x531   :  { %16 = sbr.rel (!%p14_p5) target bundleno = 2 (0x2), region = 86 }

</bundles_post_ra>
